<compile_context>
chip_gen: v7x
topology: tpu7x:2x2x1
jax: 0.10.0
libtpu: 0.0.40
codegen_flags: <defaults>
</compile_context>

<pallas_src>
import jax
import jax.numpy as jnp
from jax.experimental import pallas as pl
from jax.experimental.pallas import tpu as pltpu

NUM_HEADS = 6
FEAT_DIM = 512    # backbone output channels
HEAD_DIM = 256    # Linear(512, 256, bias=False) per Attr model


def _heads_kernel(x_ref, w_ref, o_ref):
    # x_ref: (TB, HW, C)      feature tile (f32 or bf16)
    # w_ref: (C, 6*OUT) f32   stacked head weights, pre-scaled by 1/HW
    # o_ref: (TB, 6*OUT) f32
    x = x_ref[...].astype(jnp.float32)        # upcast once; accumulate in f32
    pooled = jnp.sum(x, axis=1)               # (TB, C): sublane reduction (1/HW folded into w)
    o_ref[...] = jnp.dot(pooled, w_ref[...], preferred_element_type=jnp.float32)


def convnet_forward(feat_bhwc, head_weights, *, block_b=128):
    """feat_bhwc:   (B, H, W, 512) shared backbone feature map, channels-last
                    (f32 or bf16). NOTE: keep the backbone channels-last; converting
                    from NCHW here would add a full extra HBM pass.
    head_weights:   sequence of 6 arrays of shape (256, 512), as stored by
                    nn.Linear(512, 256, bias=False) in each Attr model.
    Returns (f1, ..., f6), each (B, 256) float32."""
    B, H, W, C = feat_bhwc.shape
    HW = H * W
    n_heads = len(head_weights)
    out_f = head_weights[0].shape[0]
    assert all(w.shape == (out_f, C) for w in head_weights)
    n_out = n_heads * out_f

    # Stack the 6 bias-free classifiers into one lane-dense (C, 6*OUT) f32 matrix and
    # fold the avg-pool 1/HW constant into it (so no per-tile divide in the kernel).
    w_stacked = jnp.concatenate(
        [jnp.transpose(w, (1, 0)).astype(jnp.float32) for w in head_weights], axis=1
    ) * (1.0 / float(HW))

    # (B, H, W, C) -> (B, HW, C): pure reshape, no transpose, no extra HBM traffic.
    x = feat_bhwc.reshape(B, HW, C)
    itemsize = jnp.dtype(x.dtype).itemsize

    # Pick a batch tile: multiple of 8, and sized so the double-buffered input/output
    # blocks plus the resident weight fit the tightest default scoped VMEM (16 MiB v5e).
    bytes_per_row = HW * C * itemsize + n_out * 4
    w_bytes = C * n_out * 4
    budget = 14 * 1024 * 1024
    avail = max(budget - 2 * w_bytes, 2 * 8 * bytes_per_row)
    tb_max = max(8, avail // (2 * bytes_per_row))
    b_ceil8 = pl.cdiv(B, 8) * 8
    tb = min(block_b, tb_max, b_ceil8)
    tb = max(8, (tb // 8) * 8)

    b_pad = pl.cdiv(B, tb) * tb
    if b_pad != B:
        # Zero-pad rows: zero features -> zero outputs, sliced off below.
        x = jnp.pad(x, ((0, b_pad - B), (0, 0), (0, 0)))
    grid = (b_pad // tb,)

    cost = pl.CostEstimate(
        flops=2 * b_pad * HW * C + 2 * b_pad * C * n_out,
        transcendentals=0,
        bytes_accessed=b_pad * HW * C * itemsize + w_bytes + b_pad * n_out * 4,
    )

    out = pl.pallas_call(
        _heads_kernel,
        out_shape=jax.ShapeDtypeStruct((b_pad, n_out), jnp.float32),
        grid=grid,
        in_specs=[
            pl.BlockSpec((tb, HW, C), lambda b: (b, 0, 0)),
            pl.BlockSpec((C, n_out), lambda b: (0, 0)),   # constant index -> stays VMEM-resident
        ],
        out_specs=pl.BlockSpec((tb, n_out), lambda b: (b, 0)),
        compiler_params=pltpu.CompilerParams(
            dimension_semantics=("parallel",),            # shard batch tiles across TCs
        ),
        cost_estimate=cost,
    )(x, w_stacked)

    out = out[:B]
    return tuple(out[:, i * out_f:(i + 1) * out_f] for i in range(n_heads))


def _reference(feat_bhwc, head_weights):
    pooled = jnp.mean(feat_bhwc.astype(jnp.float32), axis=(1, 2))        # (B, 512)
    return tuple(pooled @ w.astype(jnp.float32).T for w in head_weights)  # 6 x (B, 256)


if __name__ == "__main__":
    key = jax.random.PRNGKey(0)
    k_feat, *k_ws = jax.random.split(key, 1 + NUM_HEADS)

    # Small shapes consistent with the module: 512-channel backbone features feeding
    # six Linear(512 -> 256, bias=False) heads.
    B, H, W, C = 2, 4, 4, FEAT_DIM
    feats = jax.random.normal(k_feat, (B, H, W, C), dtype=jnp.float32)   # channels-last
    head_ws = [jax.random.normal(k, (HEAD_DIM, C), dtype=jnp.float32) * 0.02 for k in k_ws]

    # f32 path (tight check).
    outs = convnet_forward(feats, head_ws)
    outs = jax.block_until_ready(outs)
    refs = _reference(feats, head_ws)
    assert len(outs) == NUM_HEADS
    for o, r in zip(outs, refs):
        assert o.shape == (B, HEAD_DIM), o.shape
        assert jnp.allclose(o, r, atol=1e-4, rtol=1e-4), float(jnp.max(jnp.abs(o - r)))

    # bf16-carry path (halves HBM traffic; f32 accumulation inside the kernel).
    outs_bf16 = convnet_forward(feats.astype(jnp.bfloat16), head_ws)
    outs_bf16 = jax.block_until_ready(outs_bf16)
    for o, r in zip(outs_bf16, refs):
        assert o.dtype == jnp.float32
        assert jnp.allclose(o, r, atol=5e-2, rtol=5e-2), float(jnp.max(jnp.abs(o - r)))

    print("KERNEL_OK")
</pallas_src>

<mosaic_0001>
module attributes {stable_mosaic.version = 11 : i64} {
  func.func @_heads_kernel(%arg0: i32, %arg1: memref<8x16x512xf32, #tpu.memory_space<vmem>>, %arg2: memref<512x1536xf32, #tpu.memory_space<vmem>>, %arg3: memref<8x1536xf32, #tpu.memory_space<vmem>>) attributes {dimension_semantics = [#tpu.dimension_semantics<parallel>], iteration_bounds = array<i64: 1>, scalar_prefetch = 0 : i64, scratch_operands = 0 : i64, tpu.core_type = #tpu.core_type<tc>, window_params = [{transform_indices = @transform_0, window_bounds = array<i64: 8, 16, 512>}, {pipeline_mode = #tpu.pipeline_mode<synchronous>, transform_indices = @transform_1, window_bounds = array<i64: 512, 1536>}, {transform_indices = @transform_2, window_bounds = array<i64: 8, 1536>}]} {
    %c0 = arith.constant 0 : index
    %c0_0 = arith.constant 0 : index
    %c0_1 = arith.constant 0 : index
    %0 = vector.load %arg1[%c0, %c0_0, %c0_1] : memref<8x16x512xf32, #tpu.memory_space<vmem>>, vector<8x16x512xf32>
    %cst = arith.constant dense<0.000000e+00> : vector<8x512xf32>
    %1 = vector.multi_reduction <add>, %0, %cst [1] : vector<8x16x512xf32> to vector<8x512xf32>
    %c0_2 = arith.constant 0 : index
    %c0_3 = arith.constant 0 : index
    %2 = vector.load %arg2[%c0_2, %c0_3] : memref<512x1536xf32, #tpu.memory_space<vmem>>, vector<512x1536xf32>
    %cst_4 = arith.constant dense<0.000000e+00> : vector<8x1536xf32>
    %3 = tpu.matmul %1, %2, %cst_4 {dimension_numbers = #tpu.dot_dimension_numbers<[1], [0], [0], [1], [0, 0, 1, 1], [], []>} : vector<8x512xf32>, vector<512x1536xf32>, vector<8x1536xf32> -> vector<8x1536xf32>
    %c0_5 = arith.constant 0 : index
    %c0_6 = arith.constant 0 : index
    %4 = vector.load %arg3[%c0_5, %c0_6] : memref<8x1536xf32, #tpu.memory_space<vmem>>, vector<8x1536xf32>
    tpu.vector_store %arg3[%c0_5, %c0_6], %3 {strides = array<i32>} : memref<8x1536xf32, #tpu.memory_space<vmem>>, vector<8x1536xf32>,
    return
  }
  func.func @transform_0(%arg0: i32) -> (i32, i32, i32) {
    %c0_i32 = arith.constant 0 : i32
    %c0_i32_0 = arith.constant 0 : i32
    %c0_i32_1 = arith.constant 0 : i32
    return %arg0, %c0_i32, %c0_i32_0 : i32, i32, i32
  }
  func.func @transform_1(%arg0: i32) -> (i32, i32) {
    %c0_i32 = arith.constant 0 : i32
    %c0_i32_0 = arith.constant 0 : i32
    %c0_i32_1 = arith.constant 0 : i32
    return %c0_i32, %c0_i32_0 : i32, i32
  }
  func.func @transform_2(%arg0: i32) -> (i32, i32) {
    %c0_i32 = arith.constant 0 : i32
    %c0_i32_0 = arith.constant 0 : i32
    return %arg0, %c0_i32 : i32, i32
  }
}

</mosaic_0001>

<bundles_post_ra>
// kernel: tpu_custom_call.1
= control target key start
LH: loop header
LB: loop body
LE: loop exit
PB: predicated region body
PF: predicated region fallthrough
CT: control target
= control target key end

     0   :  { %7 = vsyncpa [#allocation3], 0  ;;  %s3555_s0 = inlined_call_operand.hbm [shape: f32[8,16,512], index: 0, kind: input, shape index: {}]   ;;  %s3556_s1 = inlined_call_operand.hbm [shape: f32[512,1536], index: 1, kind: input, shape index: {}]   ;;  %s3557_s2 = inlined_call_operand.hbm [shape: f32[8,1536], index: 2, kind: output, shape index: {}]  }
   0x1   :  { %8 = vsyncpa [#allocation6], 0 }
   0x2   :  { %9 = vsyncpa [#allocation4], 0  ;;  %s2906_s9 = smov [#allocation2]   ;;  %s2834_s13 = scalar_lea.hbm %s3555_s0, 8192 }
   0x3   :  { %s15_s10 = sshll.u32 %s2906_s9, 4  ;;  %p2835_p0 = scmp.ne.s32.totalorder %s3555_s0, %s2834_s13  ;;  %s16_s10 = int_to_ptr.vmem [resolvable:$true] %s15_s10 }
   0x4   :  { %p2838_p1 = scmp.lt.u32.totalorder %s2834_s13, %s3555_s0 }
   0x6   :  { %p2840_p2 = pnand %p2838_p1, %p2835_p0 }
   0x8   :  { %2843 = shalt.err (!%p2840_p2)
}
   0x9   :  { %s2844_s18 = scalar_lea.vmem %s16_s10, 8192  ;;  %p2849_p4 = scmp.lt.s32.totalorder %s16_s10, %s16_s10 }
   0xa   :  { %p2845_p3 = scmp.ne.s32.totalorder %s16_s10, %s2844_s18  ;;  %p2850_p5 = scmp.lt.s32.totalorder %s2844_s18, %s2844_s18 }
   0xc   :  { %p2851_p6 = por %p2850_p5, %p2849_p4 }
   0xe   :  { %p2852_p7 = pnand %p2851_p6, %p2845_p3 }
  0x10   :  { %2855 = shalt.err (!%p2852_p7)
}
  0x11   :  { %s2907_s19 = smov 512   ;;  %s2908_s20 = smov 32  }
  0x12   :  { %21 = dma.hbm_to_vmem [thread:$0]  %s3555_s0, 8192, %s16_s10, [#allocation3], %s2907_s19, %s2907_s19, %s2908_s20  }
  0x13   :  { %s2909_s23 = smov [#allocation5]   ;;  %s2856_s27 = scalar_lea.hbm %s3556_s1, 98304 }
  0x14   :  { %s27_s24 = sshll.u32 %s2909_s23, 4  ;;  %p2857_p8 = scmp.ne.s32.totalorder %s3556_s1, %s2856_s27  ;;  %s28_s24 = int_to_ptr.vmem [resolvable:$true] %s27_s24 }
  0x15   :  { %p2860_p9 = scmp.lt.u32.totalorder %s2856_s27, %s3556_s1 }
  0x17   :  { %p2862_p10 = pnand %p2860_p9, %p2857_p8 }
  0x19   :  { %2865 = shalt.err (!%p2862_p10)
}
  0x1a   :  { %s2866_s4 = scalar_lea.vmem %s28_s24, 98304  ;;  %p2871_p12 = scmp.lt.s32.totalorder %s28_s24, %s28_s24 }
  0x1b   :  { %p2867_p11 = scmp.ne.s32.totalorder %s28_s24, %s2866_s4  ;;  %p2872_p13 = scmp.lt.s32.totalorder %s2866_s4, %s2866_s4 }
  0x1d   :  { %p2873_p0 = por %p2872_p13, %p2871_p12 }
  0x1f   :  { %p2874_p1 = pnand %p2873_p0, %p2867_p11 }
  0x21   :  { %2877 = shalt.err (!%p2874_p1)
}
  0x22   :  { %s2910_s0 = smov 1536   ;;  %s2911_s5 = smov 96  }
  0x23   :  { %33 = dma.hbm_to_vmem [thread:$0]  %s3556_s1, 98304, %s28_s24, [#allocation6], %s2910_s0, %s2910_s0, %s2911_s5  }
  0x24   :  { %2900 = dma.done.wait [#allocation3], 8192  }
  0x25   :  { %2901 = vsyncadd [#allocation3], 4294959104 }
  0x26   :  { %2902 = dma.done.wait [#allocation6], 98304  }
  0x27   :  { %2903 = vsyncadd [#allocation6], 4294868992  ;;  %v329_v0 = vld [vmem:[#allocation5 + $0x8] sm:$0xff]  ;;  %v331_v2 = vld [vmem:[#allocation5 + $0x18] sm:$0xff]  ;;  %vm1128_vm0 = vcmask 1041409   ;;  %vm1130_vm1 = vcmask 1042434  }
  0x28   :  { %v341_v1 = vld [vmem:[#allocation5 + $0x68] sm:$0xff]  ;;  %v343_v4 = vld [vmem:[#allocation5 + $0x78] sm:$0xff]  ;;  %v328_v5 = vld [vmem:[#allocation5] sm:$0xff]  ;;  %vm1132_vm2 = vcmask 1043459   ;;  %vm1134_vm3 = vcmask 1044484   ;;  %vm1136_vm4 = vcmask 1045509  }
  0x29   :  { %v2047_v3 = vpack.c.bf16 %v341_v1, %v329_v0  ;;  %v340_v6 = vld [vmem:[#allocation5 + $0x60] sm:$0xff]  ;;  %v2175_v7 = vpack.c.bf16 %v343_v4, %v331_v2  ;;  %v330_v9 = vld [vmem:[#allocation5 + $0x10] sm:$0xff]  ;;  %v353_v11 = vld [vmem:[#allocation5 + $0xc8] sm:$0xff]  ;;  %vm1138_vm5 = vcmask 1046534   ;;  %vm1140_vm6 = vcmask 1047559   ;;  %s2912_s1 = smov [#allocation7]  }
  0x2a   :  { %v2049_v8 = vpack.c.bf16 %v340_v6, %v328_v5  ;;  %v342_v10 = vld [vmem:[#allocation5 + $0x70] sm:$0xff]  ;;  %v365_v13 = vld [vmem:[#allocation5 + $0x128] sm:$0xff]  ;;  %v355_v14 = vld [vmem:[#allocation5 + $0xd8] sm:$0xff]  ;;  %s2037_s8 = sshll.u32 %s2912_s1, 4  ;;  %s2038_s8 = int_to_ptr.vmem [resolvable:$true] %s2037_s8 }
  0x2b   :  { %2048 = vmatprep.subr.bf16.mxu0 %v2047_v3  ;;  %v2177_v12 = vpack.c.bf16 %v342_v10, %v330_v9  ;;  %v367_v15 = vld [vmem:[#allocation5 + $0x138] sm:$0xff]  ;;  %2176 = vmatprep.subr.bf16.mxu1 %v2175_v7  ;;  %v2051_v16 = vpack.c.bf16 %v365_v13, %v353_v11  ;;  %v352_v18 = vld [vmem:[#allocation5 + $0xc0] sm:$0xff]  ;;  %v354_v20 = vld [vmem:[#allocation5 + $0xd0] sm:$0xff]  ;;  %s2878_s9 = scalar_lea.vmem %s2038_s8, 1536  ;;  %p2883_p3 = scmp.lt.s32.totalorder %s2038_s8, %s2038_s8 }
  0x2c   :  { %2050 = vmatpush1.bf16.msra.mxu0 %v2049_v8  ;;  %v2179_v17 = vpack.c.bf16 %v367_v15, %v355_v14  ;;  %v364_v19 = vld [vmem:[#allocation5 + $0x120] sm:$0xff]  ;;  %v366_v22 = vld [vmem:[#allocation5 + $0x130] sm:$0xff]  ;;  %v377_v23 = vld [vmem:[#allocation5 + $0x188] sm:$0xff]  ;;  %p2879_p2 = scmp.ne.s32.totalorder %s2038_s8, %s2878_s9  ;;  %p2884_p4 = scmp.lt.s32.totalorder %s2878_s9, %s2878_s9 }
  0x2d   :  { %2178 = vmatpush1.bf16.msra.mxu1 %v2177_v12  ;;  %v2053_v21 = vpack.c.bf16 %v364_v19, %v352_v18  ;;  %v389_v24 = vld [vmem:[#allocation5 + $0x1e8] sm:$0xff]  ;;  %2052 = vmatprep.subr.bf16.mxu0 %v2051_v16  ;;  %v2181_v25 = vpack.c.bf16 %v366_v22, %v354_v20  ;;  %v379_v27 = vld [vmem:[#allocation5 + $0x198] sm:$0xff]  ;;  %v376_v29 = vld [vmem:[#allocation5 + $0x180] sm:$0xff] }
  0x2e   :  { %2180 = vmatprep.subr.bf16.mxu1 %v2179_v17  ;;  %v2055_v26 = vpack.c.bf16 %v389_v24, %v377_v23  ;;  %v391_v28 = vld [vmem:[#allocation5 + $0x1f8] sm:$0xff]  ;;  %v388_v31 = vld [vmem:[#allocation5 + $0x1e0] sm:$0xff]  ;;  %v378_v32 = vld [vmem:[#allocation5 + $0x190] sm:$0xff]  ;;  %p2885_p5 = por %p2884_p4, %p2883_p3 }
  0x2f   :  { %v2183_v30 = vpack.c.bf16 %v391_v28, %v379_v27  ;;  %v390_v33 = vld [vmem:[#allocation5 + $0x1f0] sm:$0xff]  ;;  %v2057_v34 = vpack.c.bf16 %v388_v31, %v376_v29  ;;  %v401_v35 = vld [vmem:[#allocation5 + $0x248] sm:$0xff]  ;;  %v403_v37 = vld [vmem:[#allocation5 + $0x258] sm:$0xff] }
  0x30   :  { %2054 = vmatpush1.bf16.msra.mxu0 %v2053_v21  ;;  %v413_v36 = vld [vmem:[#allocation5 + $0x2a8] sm:$0xff]  ;;  %v2185_v38 = vpack.c.bf16 %v390_v33, %v378_v32  ;;  %v415_v40 = vld [vmem:[#allocation5 + $0x2b8] sm:$0xff]  ;;  %v400_v41 = vld [vmem:[#allocation5 + $0x240] sm:$0xff]  ;;  %p2886_p6 = pnand %p2885_p5, %p2879_p2 }
  0x31   :  { %2182 = vmatpush1.bf16.msra.mxu1 %v2181_v25  ;;  %2056 = vmatprep.subr.bf16.mxu0 %v2055_v26  ;;  %v2059_v39 = vpack.c.bf16 %v413_v36, %v401_v35  ;;  %v412_v42 = vld [vmem:[#allocation5 + $0x2a0] sm:$0xff]  ;;  %v2187_v43 = vpack.c.bf16 %v415_v40, %v403_v37  ;;  %v402_v44 = vld [vmem:[#allocation5 + $0x250] sm:$0xff]  ;;  %v425_v46 = vld [vmem:[#allocation5 + $0x308] sm:$0xff] }
  0x32   :  { %2184 = vmatprep.subr.bf16.mxu1 %v2183_v30  ;;  %v414_v45 = vld [vmem:[#allocation5 + $0x2b0] sm:$0xff]  ;;  %v437_v47 = vld [vmem:[#allocation5 + $0x368] sm:$0xff]  ;;  %v427_v48 = vld [vmem:[#allocation5 + $0x318] sm:$0xff]  ;;  %v2061_v50 = vpack.c.bf16 %v412_v42, %v400_v41 }
  0x33   :  { %v439_v49 = vld [vmem:[#allocation5 + $0x378] sm:$0xff]  ;;  %v2189_v51 = vpack.c.bf16 %v414_v45, %v402_v44  ;;  %v2063_v52 = vpack.c.bf16 %v437_v47, %v425_v46  ;;  %v424_v53 = vld [vmem:[#allocation5 + $0x300] sm:$0xff]  ;;  %v426_v55 = vld [vmem:[#allocation5 + $0x310] sm:$0xff] }
  0x34   :  { %2058 = vmatpush1.bf16.msra.mxu0 %v2057_v34  ;;  %v436_v54 = vld [vmem:[#allocation5 + $0x360] sm:$0xff]  ;;  %v2191_v56 = vpack.c.bf16 %v439_v49, %v427_v48  ;;  %v438_v57 = vld [vmem:[#allocation5 + $0x370] sm:$0xff]  ;;  %v449_v58 = vld [vmem:[#allocation5 + $0x3c8] sm:$0xff] }
  0x35   :  { %2186 = vmatpush1.bf16.msra.mxu1 %v2185_v38  ;;  %2060 = vmatprep.subr.bf16.mxu0 %v2059_v39  ;;  %v461_v59 = vld [vmem:[#allocation5 + $0x428] sm:$0xff]  ;;  %v451_v60 = vld [vmem:[#allocation5 + $0x3d8] sm:$0xff]  ;;  %v2065_v62 = vpack.c.bf16 %v436_v54, %v424_v53  ;;  %v2193_v63 = vpack.c.bf16 %v438_v57, %v426_v55  ;;  %v448_v1 = vld [vmem:[#allocation5 + $0x3c0] sm:$0xff] }
  0x36   :  { %2188 = vmatprep.subr.bf16.mxu1 %v2187_v43  ;;  %v463_v61 = vld [vmem:[#allocation5 + $0x438] sm:$0xff]  ;;  %v2067_v0 = vpack.c.bf16 %v461_v59, %v449_v58  ;;  %v460_v2 = vld [vmem:[#allocation5 + $0x420] sm:$0xff]  ;;  %v450_v3 = vld [vmem:[#allocation5 + $0x3d0] sm:$0xff] }
  0x37   :  { %v2195_v4 = vpack.c.bf16 %v463_v61, %v451_v60  ;;  %v462_v5 = vld [vmem:[#allocation5 + $0x430] sm:$0xff]  ;;  %v473_v6 = vld [vmem:[#allocation5 + $0x488] sm:$0xff]  ;;  %v475_v8 = vld [vmem:[#allocation5 + $0x498] sm:$0xff]  ;;  %v2069_v10 = vpack.c.bf16 %v460_v2, %v448_v1 }
  0x38   :  { %2062 = vmatpush1.bf16.msra.mxu0 %v2061_v50  ;;  %v485_v7 = vld [vmem:[#allocation5 + $0x4e8] sm:$0xff]  ;;  %v487_v9 = vld [vmem:[#allocation5 + $0x4f8] sm:$0xff]  ;;  %v2197_v11 = vpack.c.bf16 %v462_v5, %v450_v3  ;;  %v472_v13 = vld [vmem:[#allocation5 + $0x480] sm:$0xff] }
  0x39   :  { %2190 = vmatpush1.bf16.msra.mxu1 %v2189_v51  ;;  %2064 = vmatprep.subr.bf16.mxu0 %v2063_v52  ;;  %v2071_v12 = vpack.c.bf16 %v485_v7, %v473_v6  ;;  %v484_v14 = vld [vmem:[#allocation5 + $0x4e0] sm:$0xff]  ;;  %v474_v15 = vld [vmem:[#allocation5 + $0x490] sm:$0xff]  ;;  %v2199_v16 = vpack.c.bf16 %v487_v9, %v475_v8  ;;  %v497_v18 = vld [vmem:[#allocation5 + $0x548] sm:$0xff] }
  0x3a   :  { %2192 = vmatprep.subr.bf16.mxu1 %v2191_v56  ;;  %v486_v17 = vld [vmem:[#allocation5 + $0x4f0] sm:$0xff]  ;;  %v509_v19 = vld [vmem:[#allocation5 + $0x5a8] sm:$0xff]  ;;  %v499_v20 = vld [vmem:[#allocation5 + $0x558] sm:$0xff]  ;;  %v2073_v22 = vpack.c.bf16 %v484_v14, %v472_v13 }
  0x3b   :  { %v511_v21 = vld [vmem:[#allocation5 + $0x5b8] sm:$0xff]  ;;  %v2201_v23 = vpack.c.bf16 %v486_v17, %v474_v15  ;;  %v2075_v24 = vpack.c.bf16 %v509_v19, %v497_v18  ;;  %v496_v25 = vld [vmem:[#allocation5 + $0x540] sm:$0xff]  ;;  %v498_v27 = vld [vmem:[#allocation5 + $0x550] sm:$0xff] }
  0x3c   :  { %2066 = vmatpush1.bf16.msra.mxu0 %v2065_v62  ;;  %v508_v26 = vld [vmem:[#allocation5 + $0x5a0] sm:$0xff]  ;;  %v2203_v28 = vpack.c.bf16 %v511_v21, %v499_v20  ;;  %v510_v29 = vld [vmem:[#allocation5 + $0x5b0] sm:$0xff]  ;;  %v521_v30 = vld [vmem:[#allocation5 + $0x608] sm:$0xff] }
  0x3d   :  { %2194 = vmatpush1.bf16.msra.mxu1 %v2193_v63  ;;  %2068 = vmatprep.subr.bf16.mxu0 %v2067_v0  ;;  %v533_v31 = vld [vmem:[#allocation5 + $0x668] sm:$0xff]  ;;  %v523_v32 = vld [vmem:[#allocation5 + $0x618] sm:$0xff]  ;;  %v2077_v34 = vpack.c.bf16 %v508_v26, %v496_v25  ;;  %v2205_v35 = vpack.c.bf16 %v510_v29, %v498_v27  ;;  %v520_v37 = vld [vmem:[#allocation5 + $0x600] sm:$0xff] }
  0x3e   :  { %2196 = vmatprep.subr.bf16.mxu1 %v2195_v4  ;;  %v535_v33 = vld [vmem:[#allocation5 + $0x678] sm:$0xff]  ;;  %v2079_v36 = vpack.c.bf16 %v533_v31, %v521_v30  ;;  %v532_v38 = vld [vmem:[#allocation5 + $0x660] sm:$0xff]  ;;  %v522_v39 = vld [vmem:[#allocation5 + $0x610] sm:$0xff] }
  0x3f   :  { %v2207_v40 = vpack.c.bf16 %v535_v33, %v523_v32  ;;  %v534_v41 = vld [vmem:[#allocation5 + $0x670] sm:$0xff]  ;;  %v545_v42 = vld [vmem:[#allocation5 + $0x6c8] sm:$0xff]  ;;  %v547_v44 = vld [vmem:[#allocation5 + $0x6d8] sm:$0xff]  ;;  %v2081_v47 = vpack.c.bf16 %v532_v38, %v520_v37 }
  0x40   :  { %2070 = vmatpush1.bf16.msra.mxu0 %v2069_v10  ;;  %v557_v43 = vld [vmem:[#allocation5 + $0x728] sm:$0xff]  ;;  %v559_v45 = vld [vmem:[#allocation5 + $0x738] sm:$0xff]  ;;  %v544_v46 = vld [vmem:[#allocation5 + $0x6c0] sm:$0xff]  ;;  %v2209_v51 = vpack.c.bf16 %v534_v41, %v522_v39 }
  0x41   :  { %2198 = vmatpush1.bf16.msra.mxu1 %v2197_v11  ;;  %2072 = vmatprep.subr.bf16.mxu0 %v2071_v12  ;;  %v556_v48 = vld [vmem:[#allocation5 + $0x720] sm:$0xff]  ;;  %v2952_v49 = vld [vmem:[#allocation5 + $0x6d0] sm:$0xff]  ;;  %v2083_v52 = vpack.c.bf16 %v557_v43, %v545_v42  ;;  %v569_v53 = vld [vmem:[#allocation5 + $0x788] sm:$0xff]  ;;  %v2211_v56 = vpack.c.bf16 %v559_v45, %v547_v44 }
  0x42   :  { %2200 = vmatprep.subr.bf16.mxu1 %v2199_v16  ;;  %v558_v50 = vld [vmem:[#allocation5 + $0x730] sm:$0xff]  ;;  %v581_v54 = vld [vmem:[#allocation5 + $0x7e8] sm:$0xff]  ;;  %v2954_v55 = vld [vmem:[#allocation5 + $0x798] sm:$0xff]  ;;  %v2085_v4 = vpack.c.bf16 %v556_v48, %v544_v46 }
  0x43   :  { %v583_v57 = vld [vmem:[#allocation5 + $0x7f8] sm:$0xff]  ;;  %v2956_v58 = vld [vmem:[#allocation5 + $0x780] sm:$0xff]  ;;  %v2960_v60 = vld [vmem:[#allocation5 + $0x790] sm:$0xff]  ;;  %v2213_v11 = vpack.c.bf16 %v558_v50, %v2952_v49  ;;  %v2087_v12 = vpack.c.bf16 %v581_v54, %v569_v53 }
  0x44   :  { %2074 = vmatpush1.bf16.msra.mxu0 %v2073_v22  ;;  %v2958_v59 = vld [vmem:[#allocation5 + $0x7e0] sm:$0xff]  ;;  %v2962_v61 = vld [vmem:[#allocation5 + $0x7f0] sm:$0xff]  ;;  %v2964_v62 = vld [vmem:[#allocation5 + $0x848] sm:$0xff]  ;;  %v2215_v21 = vpack.c.bf16 %v583_v57, %v2954_v55 }
  0x45   :  { %2202 = vmatpush1.bf16.msra.mxu1 %v2201_v23  ;;  %2076 = vmatprep.subr.bf16.mxu0 %v2075_v24  ;;  %v2966_v63 = vld [vmem:[#allocation5 + $0x8a8] sm:$0xff]  ;;  %v2968_v0 = vld [vmem:[#allocation5 + $0x858] sm:$0xff]  ;;  %v2972_v2 = vld [vmem:[#allocation5 + $0x840] sm:$0xff]  ;;  %v2089_v29 = vpack.c.bf16 %v2958_v59, %v2956_v58  ;;  %v2217_v33 = vpack.c.bf16 %v2962_v61, %v2960_v60 }
  0x46   :  { %2204 = vmatprep.subr.bf16.mxu1 %v2203_v28  ;;  %v2970_v1 = vld [vmem:[#allocation5 + $0x8b8] sm:$0xff]  ;;  %v2974_v3 = vld [vmem:[#allocation5 + $0x8a0] sm:$0xff]  ;;  %v2976_v5 = vld [vmem:[#allocation5 + $0x850] sm:$0xff] }
  0x47   :  { %v2978_v6 = vld [vmem:[#allocation5 + $0x8b0] sm:$0xff]  ;;  %v2980_v7 = vld [vmem:[#allocation5 + $0x908] sm:$0xff]  ;;  %v2984_v9 = vld [vmem:[#allocation5 + $0x918] sm:$0xff] }
  0x48   :  { %2078 = vmatpush1.bf16.msra.mxu0 %v2077_v34  ;;  %v2982_v8 = vld [vmem:[#allocation5 + $0x968] sm:$0xff]  ;;  %v2986_v10 = vld [vmem:[#allocation5 + $0x978] sm:$0xff]  ;;  %v2989_v13 = vld [vmem:[#allocation5 + $0x900] sm:$0xff]  ;;  %v2091_v34 = vpack.c.bf16 %v2966_v63, %v2964_v62 }
  0x49   :  { %2206 = vmatpush1.bf16.msra.mxu1 %v2205_v35  ;;  %2080 = vmatprep.subr.bf16.mxu0 %v2079_v36  ;;  %v2991_v14 = vld [vmem:[#allocation5 + $0x960] sm:$0xff]  ;;  %v2993_v15 = vld [vmem:[#allocation5 + $0x910] sm:$0xff]  ;;  %v2997_v17 = vld [vmem:[#allocation5 + $0x9c8] sm:$0xff]  ;;  %v2219_v35 = vpack.c.bf16 %v2970_v1, %v2968_v0  ;;  %v2093_v36 = vpack.c.bf16 %v2974_v3, %v2972_v2  ;;  %v2095_v41 = vpack.c.bf16 %v2982_v8, %v2980_v7 }
  0x4a   :  { %2208 = vmatprep.subr.bf16.mxu1 %v2207_v40  ;;  %v2995_v16 = vld [vmem:[#allocation5 + $0x970] sm:$0xff]  ;;  %v2999_v18 = vld [vmem:[#allocation5 + $0xa28] sm:$0xff]  ;;  %v3001_v19 = vld [vmem:[#allocation5 + $0x9d8] sm:$0xff]  ;;  %v2221_v40 = vpack.c.bf16 %v2978_v6, %v2976_v5  ;;  %v2223_v42 = vpack.c.bf16 %v2986_v10, %v2984_v9  ;;  %v2097_v46 = vpack.c.bf16 %v2991_v14, %v2989_v13 }
  0x4b   :  { %v3003_v20 = vld [vmem:[#allocation5 + $0xa38] sm:$0xff]  ;;  %v3006_v22 = vld [vmem:[#allocation5 + $0x9c0] sm:$0xff]  ;;  %v3010_v24 = vld [vmem:[#allocation5 + $0x9d0] sm:$0xff]  ;;  %v2099_v48 = vpack.c.bf16 %v2999_v18, %v2997_v17 }
  0x4c   :  { %2082 = vmatpush1.bf16.msra.mxu0 %v2081_v47  ;;  %v3008_v23 = vld [vmem:[#allocation5 + $0xa20] sm:$0xff]  ;;  %v3012_v25 = vld [vmem:[#allocation5 + $0xa30] sm:$0xff]  ;;  %v3014_v26 = vld [vmem:[#allocation5 + $0xa88] sm:$0xff]  ;;  %v2225_v47 = vpack.c.bf16 %v2995_v16, %v2993_v15  ;;  %v2227_v49 = vpack.c.bf16 %v3003_v20, %v3001_v19 }
  0x4d   :  { %2210 = vmatpush1.bf16.msra.mxu1 %v2209_v51  ;;  %2084 = vmatprep.subr.bf16.mxu0 %v2083_v52  ;;  %v3016_v27 = vld [vmem:[#allocation5 + $0xae8] sm:$0xff]  ;;  %v3018_v28 = vld [vmem:[#allocation5 + $0xa98] sm:$0xff]  ;;  %v3024_v31 = vld [vmem:[#allocation5 + $0xa80] sm:$0xff]  ;;  %v2101_v55 = vpack.c.bf16 %v3008_v23, %v3006_v22 }
  0x4e   :  { %2212 = vmatprep.subr.bf16.mxu1 %v2211_v56  ;;  %v3022_v30 = vld [vmem:[#allocation5 + $0xaf8] sm:$0xff]  ;;  %v3026_v32 = vld [vmem:[#allocation5 + $0xae0] sm:$0xff]  ;;  %v3036_v37 = vld [vmem:[#allocation5 + $0xa90] sm:$0xff] }
  0x4f   :  { %v3038_v38 = vld [vmem:[#allocation5 + $0xaf0] sm:$0xff]  ;;  %v3040_v39 = vld [vmem:[#allocation5 + $0xb48] sm:$0xff]  ;;  %v3050_v44 = vld [vmem:[#allocation5 + $0xb58] sm:$0xff] }
  0x50   :  { %2086 = vmatpush1.bf16.msra.mxu0 %v2085_v4  ;;  %v3048_v43 = vld [vmem:[#allocation5 + $0xba8] sm:$0xff]  ;;  %v3052_v45 = vld [vmem:[#allocation5 + $0xbb8] sm:$0xff]  ;;  %v3062_v50 = vld [vmem:[#allocation5 + $0xb40] sm:$0xff] }
  0x51   :  { %2214 = vmatpush1.bf16.msra.mxu1 %v2213_v11  ;;  %2088 = vmatprep.subr.bf16.mxu0 %v2087_v12  ;;  %v3064_v51 = vld [vmem:[#allocation5 + $0xba0] sm:$0xff]  ;;  %v3066_v52 = vld [vmem:[#allocation5 + $0xb50] sm:$0xff]  ;;  %v41_v54 = vld [vmem:[#allocation2 + $0x8] sm:$0xff] }
  0x52   :  { %2216 = vmatprep.subr.bf16.mxu1 %v2215_v21  ;;  %v3068_v53 = vld [vmem:[#allocation5 + $0xbb0] sm:$0xff]  ;;  %v45_v59 = vld [vmem:[#allocation2 + $0x28] sm:$0xff] }
  0x53   :  { %v49_v60 = vld [vmem:[#allocation2 + $0x48] sm:$0xff]  ;;  %v111_v3 = vadd.f32 %v45_v59, %v41_v54 }
  0x54   :  { %v53_v61 = vld [vmem:[#allocation2 + $0x68] sm:$0xff]  ;;  %2090 = vmatpush1.bf16.msra.mxu0 %v2089_v29 }
  0x55   :  { %v57_v0 = vld [vmem:[#allocation2 + $0x88] sm:$0xff]  ;;  %v139_v4 = vadd.f32 %v53_v61, %v49_v60  ;;  %2218 = vmatpush1.bf16.msra.mxu1 %v2217_v33  ;;  %2092 = vmatprep.subr.bf16.mxu0 %v2091_v34  ;;  %v112_v62 = vrot.slane %v111_v3, 4  ;;  %v2109_v33 = vpack.c.bf16 %v3064_v51, %v3062_v50 }
  0x56   :  { %v61_v1 = vld [vmem:[#allocation2 + $0xa8] sm:$0xff]  ;;  %2220 = vmatprep.subr.bf16.mxu1 %v2219_v35 }
  0x57   :  { %v65_v2 = vld [vmem:[#allocation2 + $0xc8] sm:$0xff]  ;;  %v167_v12 = vadd.f32 %v61_v1, %v57_v0  ;;  %v140_v58 = vrot.slane %v139_v4, 4  ;;  %v113_v35 = vadd.f32 %v112_v62, %v111_v3 }
  0x58   :  { %v69_v7 = vld [vmem:[#allocation2 + $0xe8] sm:$0xff]  ;;  %2094 = vmatpush1.bf16.msra.mxu0 %v2093_v36 }
  0x59   :  { %v73_v8 = vld [vmem:[#allocation2 + $0x108] sm:$0xff]  ;;  %v195_v54 = vadd.f32 %v69_v7, %v65_v2  ;;  %v168_v5 = vrot.slane %v167_v12, 4  ;;  %v141_v0 = vadd.f32 %v140_v58, %v139_v4  ;;  %2222 = vmatpush1.bf16.msra.mxu1 %v2221_v40  ;;  %2096 = vmatprep.subr.bf16.mxu0 %v2095_v41  ;;  %v114_v34 = vrot.slane %v113_v35, 2 }
  0x5a   :  { %v77_v11 = vld [vmem:[#allocation2 + $0x128] sm:$0xff]  ;;  %2224 = vmatprep.subr.bf16.mxu1 %v2223_v42 }
  0x5b   :  { %v81_v21 = vld [vmem:[#allocation2 + $0x148] sm:$0xff]  ;;  %v223_v59 = vadd.f32 %v77_v11, %v73_v8  ;;  %v196_v1 = vrot.slane %v195_v54, 4  ;;  %v169_v2 = vadd.f32 %v168_v5, %v167_v12  ;;  %v115_v40 = vadd.f32 %v114_v34, %v113_v35  ;;  %v44_v35 = vld [vmem:[#allocation2 + $0x20] sm:$0xff] }
  0x5c   :  { %v85_v29 = vld [vmem:[#allocation2 + $0x168] sm:$0xff]  ;;  %2098 = vmatpush1.bf16.msra.mxu0 %v2097_v46  ;;  %v3582_v34 = vpack.c.bf16 %v3012_v25, %v3010_v24 }
  0x5d   :  { %v89_v63 = vld [vmem:[#allocation2 + $0x188] sm:$0xff]  ;;  %v251_v57 = vadd.f32 %v85_v29, %v81_v21  ;;  %v224_v56 = vrot.slane %v223_v59, 4  ;;  %v142_v21 = vrot.slane %v141_v0, 2  ;;  %v197_v29 = vadd.f32 %v196_v1, %v195_v54  ;;  %2226 = vmatpush1.bf16.msra.mxu1 %v2225_v47  ;;  %2100 = vmatprep.subr.bf16.mxu0 %v2099_v48  ;;  %v3114_v54 = vld [vmem:[#allocation5 + $0xc78] sm:$0xff]  ;;  %v52_v1 = vld [vmem:[#allocation2 + $0x60] sm:$0xff] }
  0x5e   :  { %v93_v60 = vld [vmem:[#allocation2 + $0x1a8] sm:$0xff]  ;;  %v170_v58 = vrot.slane %v169_v2, 2  ;;  %2228 = vmatprep.subr.bf16.mxu1 %v2227_v49  ;;  %v116_v13 = vrot.slane %v115_v40, 1  ;;  %v3112_v49 = vld [vmem:[#allocation5 + $0xc18] sm:$0xff] }
  0x5f   :  { %v97_v61 = vld [vmem:[#allocation2 + $0x1c8] sm:$0xff]  ;;  %v252_v7 = vrot.slane %v251_v57, 4  ;;  %v279_v8 = vadd.f32 %v93_v60, %v89_v63  ;;  %v225_v36 = vadd.f32 %v224_v56, %v223_v59  ;;  %v143_v41 = vadd.f32 %v142_v21, %v141_v0  ;;  %v40_v59 = vld [vmem:[#allocation2] sm:$0xff] }
  0x60   :  { %v101_v6 = vld [vmem:[#allocation2 + $0x1e8] sm:$0xff]  ;;  %v198_v63 = vrot.slane %v197_v29, 2  ;;  %v171_v9 = vadd.f32 %v170_v58, %v169_v2  ;;  %2102 = vmatpush1.bf16.msra.mxu0 %v2101_v55  ;;  %v117_v18 = vadd.f32 %v116_v13, %v115_v40  ;;  %v3583_v60 = vpack.c.bf16 %v3016_v27, %v3014_v26  ;;  %v48_v0 = vld [vmem:[#allocation2 + $0x40] sm:$0xff] }
  0x61   :  { %v307_v11 = vadd.f32 %v101_v6, %v97_v61  ;;  %v253_v62 = vadd.f32 %v252_v7, %v251_v57  ;;  %v280_v3 = vrot.slane %v279_v8, 4  ;;  %v226_v5 = vrot.slane %v225_v36, 2  ;;  %v3105_v47 = vld [vmem:[#allocation5 + $0xc08] sm:$0xff]  ;;  %2230 = vmatpush1.bf16.msra.mxu1 %v3582_v34  ;;  %v56_v26 = vld [vmem:[#allocation2 + $0x80] sm:$0xff] }
  0x62   :  { %v144_v14 = vrot.slane %v143_v41, 1  ;;  %v199_v46 = vadd.f32 %v198_v63, %v197_v29  ;;  %v172_v6 = vrot.slane %v171_v9, 1  ;;  %v3107_v17 = vld [vmem:[#allocation5 + $0xc68] sm:$0xff]  ;;  %2104 = vmatprep.subr.bf16.mxu0 %v3583_v60  ;;  %v3584_v2 = vpack.c.bf16 %v3022_v30, %v3018_v28  ;;  %v60_v27 = vld [vmem:[#allocation2 + $0xa0] sm:$0xff] }
  0x63   :  { %v308_v4 = vrot.slane %v307_v11, 4  ;;  %v254_v10 = vrot.slane %v253_v62, 2  ;;  %v281_v42 = vadd.f32 %v280_v3, %v279_v8  ;;  %v227_v57 = vadd.f32 %v226_v5, %v225_v36  ;;  %v64_v58 = vld [vmem:[#allocation2 + $0xc0] sm:$0xff] }
  0x64   :  { %v145_v48 = vadd.f32 %v144_v14, %v143_v41  ;;  %v200_v19 = vrot.slane %v199_v46, 1  ;;  %v173_v61 = vadd.f32 %v172_v6, %v171_v9  ;;  %2232 = vmatprep.subr.bf16.mxu1 %v3584_v2  ;;  %v2111_v25 = vpack.c.bf16 %v3107_v17, %v3105_v47  ;;  %v72_v3 = vld [vmem:[#allocation2 + $0x100] sm:$0xff] }
  0x65   :  { %v309_v56 = vadd.f32 %v308_v4, %v307_v11  ;;  %v255_v12 = vadd.f32 %v254_v10, %v253_v62  ;;  %v282_v15 = vrot.slane %v281_v42, 2  ;;  %v228_v20 = vrot.slane %v227_v57, 1  ;;  %v68_v62 = vld [vmem:[#allocation2 + $0xe0] sm:$0xff] }
  0x66   :  { %v201_v7 = vadd.f32 %v200_v19, %v199_v46  ;;  %v1142_v24 = vsel %vm1128_vm0, %v145_v48, %v117_v18  ;;  %v3585_v28 = vpack.c.bf16 %v3026_v32, %v3024_v31  ;;  %v2239_v4 = vpack.c.bf16 %v3114_v54, %v3112_v49  ;;  %v76_v40 = vld [vmem:[#allocation2 + $0x120] sm:$0xff] }
  0x67   :  { %v310_v16 = vrot.slane %v309_v56, 2  ;;  %v256_v22 = vrot.slane %v255_v12, 1  ;;  %v283_v23 = vadd.f32 %v282_v15, %v281_v42  ;;  %v229_v8 = vadd.f32 %v228_v20, %v227_v57  ;;  %v80_v41 = vld [vmem:[#allocation2 + $0x140] sm:$0xff] }
  0x68   :  { %v1143_v36 = vsel %vm1130_vm1, %v173_v61, %v1142_v24  ;;  %2106 = vmatpush1.bf16.msra.mxu0 %v3585_v28  ;;  %v84_v63 = vld [vmem:[#allocation2 + $0x160] sm:$0xff]  ;;  %v104_v5 = vadd.f32 %v44_v35, %v40_v59  ;;  %v132_v9 = vadd.f32 %v52_v1, %v48_v0  ;;  %v3586_v10 = vpack.c.bf16 %v3038_v38, %v3036_v37 }
  0x69   :  { %v311_v55 = vadd.f32 %v310_v16, %v309_v56  ;;  %v257_v11 = vadd.f32 %v256_v22, %v255_v12  ;;  %v284_v21 = vrot.slane %v283_v23, 1  ;;  %v1144_v30 = vsel %vm1132_vm2, %v201_v7, %v1143_v36  ;;  %v88_v46 = vld [vmem:[#allocation2 + $0x180] sm:$0xff] }
  0x6a   :  { %2234 = vmatpush1.bf16.msra.mxu1 %v3586_v10  ;;  %v3587_v42 = vpack.c.bf16 %v3048_v43, %v3040_v39  ;;  %v1145_v56 = vsel %vm1134_vm3, %v229_v8, %v1144_v30  ;;  %v3588_v13 = vpack.c.bf16 %v3052_v45, %v3050_v44  ;;  %v92_v57 = vld [vmem:[#allocation2 + $0x1a0] sm:$0xff]  ;;  %v105_v6 = vrot.slane %v104_v5, 4 }
  0x6b   :  { %v312_v29 = vrot.slane %v311_v55, 1  ;;  %v285_v31 = vadd.f32 %v284_v21, %v283_v23  ;;  %v1146_v14 = vsel %vm1136_vm4, %v257_v11, %v1145_v56  ;;  %v133_v37 = vrot.slane %v132_v9, 4  ;;  %v96_v39 = vld [vmem:[#allocation2 + $0x1c0] sm:$0xff] }
  0x6c   :  { %2108 = vmatprep.subr.bf16.mxu0 %v3587_v42  ;;  %2236 = vmatprep.subr.bf16.mxu1 %v3588_v13  ;;  %v160_v38 = vadd.f32 %v60_v27, %v56_v26  ;;  %v100_v43 = vld [vmem:[#allocation2 + $0x1e0] sm:$0xff]  ;;  %v188_v15 = vadd.f32 %v68_v62, %v64_v58  ;;  %v216_v16 = vadd.f32 %v76_v40, %v72_v3 }
  0x6d   :  { %v313_v32 = vadd.f32 %v312_v29, %v311_v55  ;;  %v1147_v12 = vsel %vm1138_vm5, %v285_v31, %v1146_v14  ;;  %v244_v47 = vadd.f32 %v84_v63, %v80_v41  ;;  %2110 = vmatpush1.bf16.msra.mxu0 %v2109_v33  ;;  %v106_v45 = vadd.f32 %v105_v6, %v104_v5  ;;  %v712_v31 = vld [vmem:[#allocation5 + $0xc00] sm:$0xff]  ;;  %v714_v14 = vld [vmem:[#allocation5 + $0xc10] sm:$0xff] }
  0x6e   :  { %v134_v17 = vadd.f32 %v133_v37, %v132_v9  ;;  %v161_v18 = vrot.slane %v160_v38, 4  ;;  %v3590_v48 = vpack.c.bf16 %v3068_v53, %v3066_v52  ;;  %v189_v19 = vrot.slane %v188_v15, 4  ;;  %2112 = vmatprep.subr.bf16.mxu0 %v2111_v25 }
  0x6f   :  { %v3151_v44 = vsel %vm1140_vm6, %v313_v32, %v1147_v12  ;;  %v217_v20 = vrot.slane %v216_v16, 4  ;;  %v245_v49 = vrot.slane %v244_v47, 4  ;;  %v272_v54 = vadd.f32 %v92_v57, %v88_v46  ;;  %v724_v32 = vld [vmem:[#allocation5 + $0xc60] sm:$0xff]  ;;  %v726_v46 = vld [vmem:[#allocation5 + $0xc70] sm:$0xff]  ;;  %v737_v57 = vld [vmem:[#allocation5 + $0xcc8] sm:$0xff] }
  0x70   :  { %3589 = vst [vmem:[#allocation11_spill] sm:$0xff] %v3151_v44  ;;  %2238 = vmatpush1.bf16.msra.mxu1 %v3590_v48  ;;  %1231 = vmatprep.mubr.f32.mxu0 %v3151_v44  ;;  %v107_v50 = vrot.slane %v106_v45, 2  ;;  %v135_v51 = vrot.slane %v134_v17, 2  ;;  %v162_v33 = vadd.f32 %v161_v18, %v160_v38  ;;  %v300_v59 = vadd.f32 %v100_v43, %v96_v39  ;;  %v749_v38 = vld [vmem:[#allocation5 + $0xd28] sm:$0xff]  ;;  %v739_v12 = vld [vmem:[#allocation5 + $0xcd8] sm:$0xff]  ;;  %v748_v18 = vld [vmem:[#allocation5 + $0xd20] sm:$0xff] }
  0x71   :  { %1373 = vmatprep.mubr.f32.mxu1 %v3151_v44  ;;  %2240 = vmatprep.subr.bf16.mxu1 %v2239_v4  ;;  %v190_v34 = vadd.f32 %v189_v19, %v188_v15  ;;  %v218_v60 = vadd.f32 %v217_v20, %v216_v16  ;;  %v246_v61 = vadd.f32 %v245_v49, %v244_v47  ;;  %v273_v22 = vrot.slane %v272_v54, 4  ;;  %v751_v39 = vld [vmem:[#allocation5 + $0xd38] sm:$0xff]  ;;  %v738_v49 = vld [vmem:[#allocation5 + $0xcd0] sm:$0xff] }
  0x72   :  { %v108_v52 = vadd.f32 %v107_v50, %v106_v45  ;;  %v136_v53 = vadd.f32 %v135_v51, %v134_v17  ;;  %v163_v23 = vrot.slane %v162_v33, 2  ;;  %v301_v55 = vrot.slane %v300_v59, 4  ;;  %v736_v17 = vld [vmem:[#allocation5 + $0xcc0] sm:$0xff]  ;;  %v761_v50 = vld [vmem:[#allocation5 + $0xd88] sm:$0xff]  ;;  %v3355_v44 = vld [vmem:[#allocation5 + $0x14b8] sm:$0xff] }
  0x73   :  { %v191_v35 = vrot.slane %v190_v34, 2  ;;  %v219_v0 = vrot.slane %v218_v60, 2  ;;  %v247_v1 = vrot.slane %v246_v61, 2  ;;  %v274_v2 = vadd.f32 %v273_v22, %v272_v54  ;;  %v750_v54 = vld [vmem:[#allocation5 + $0xd30] sm:$0xff] }
  0x74   :  { %v109_v7 = vrot.slane %v108_v52, 1  ;;  %v137_v8 = vrot.slane %v136_v53, 1  ;;  %v164_v24 = vadd.f32 %v163_v23, %v162_v33  ;;  %v302_v25 = vadd.f32 %v301_v55, %v300_v59  ;;  %v773_v33 = vld [vmem:[#allocation5 + $0xde8] sm:$0xff]  ;;  %v763_v59 = vld [vmem:[#allocation5 + $0xd98] sm:$0xff]  ;;  %v3173_v22 = vld [vmem:[#allocation5 + $0xd90] sm:$0xff] }
  0x75   :  { %v192_v26 = vadd.f32 %v191_v35, %v190_v34  ;;  %v220_v27 = vadd.f32 %v219_v0, %v218_v60  ;;  %v248_v11 = vadd.f32 %v247_v1, %v246_v61  ;;  %v275_v21 = vrot.slane %v274_v2, 2  ;;  %v775_v34 = vld [vmem:[#allocation5 + $0xdf8] sm:$0xff]  ;;  %v3169_v60 = vld [vmem:[#allocation5 + $0xd80] sm:$0xff]  ;;  %v3177_v55 = vld [vmem:[#allocation5 + $0xe48] sm:$0xff] }
  0x76   :  { %v110_v29 = vadd.f32 %v109_v7, %v108_v52  ;;  %v138_v36 = vadd.f32 %v137_v8, %v136_v53  ;;  %v165_v58 = vrot.slane %v164_v24, 1  ;;  %v303_v62 = vrot.slane %v302_v25, 2  ;;  %v3171_v61 = vld [vmem:[#allocation5 + $0xde0] sm:$0xff]  ;;  %v3175_v52 = vld [vmem:[#allocation5 + $0xdf0] sm:$0xff]  ;;  %v3179_v35 = vld [vmem:[#allocation5 + $0xea8] sm:$0xff] }
  0x77   :  { %v193_v3 = vrot.slane %v192_v26, 1  ;;  %v221_v28 = vrot.slane %v220_v27, 1  ;;  %v249_v30 = vrot.slane %v248_v11, 1  ;;  %v276_v4 = vadd.f32 %v275_v21, %v274_v2  ;;  %v3181_v0 = vld [vmem:[#allocation5 + $0xe58] sm:$0xff]  ;;  %v3185_v8 = vld [vmem:[#allocation5 + $0xe40] sm:$0xff] }
  0x78   :  { %v166_v40 = vadd.f32 %v165_v58, %v164_v24  ;;  %v304_v41 = vadd.f32 %v303_v62, %v302_v25  ;;  %v1129_v63 = vsel %vm1128_vm0, %v138_v36, %v110_v29  ;;  %v2113_v47 = vpack.c.bf16 %v724_v32, %v712_v31  ;;  %v3183_v1 = vld [vmem:[#allocation5 + $0xeb8] sm:$0xff]  ;;  %v3187_v24 = vld [vmem:[#allocation5 + $0xea0] sm:$0xff]  ;;  %v3189_v25 = vld [vmem:[#allocation5 + $0xe50] sm:$0xff] }
  0x79   :  { %v194_v5 = vadd.f32 %v193_v3, %v192_v26  ;;  %v222_v9 = vadd.f32 %v221_v28, %v220_v27  ;;  %v250_v10 = vadd.f32 %v249_v30, %v248_v11  ;;  %v277_v42 = vrot.slane %v276_v4, 1  ;;  %v3191_v26 = vld [vmem:[#allocation5 + $0xeb0] sm:$0xff]  ;;  %v3193_v27 = vld [vmem:[#allocation5 + $0xf08] sm:$0xff]  ;;  %v3197_v21 = vld [vmem:[#allocation5 + $0xf18] sm:$0xff] }
  0x7a   :  { %v305_v56 = vrot.slane %v304_v41, 1  ;;  %v1131_v13 = vsel %vm1130_vm1, %v166_v40, %v1129_v63  ;;  %v2241_v45 = vpack.c.bf16 %v726_v46, %v714_v14  ;;  %v2115_v19 = vpack.c.bf16 %v749_v38, %v737_v57  ;;  %v3195_v11 = vld [vmem:[#allocation5 + $0xf68] sm:$0xff]  ;;  %v3199_v29 = vld [vmem:[#allocation5 + $0xf78] sm:$0xff]  ;;  %v3201_v36 = vld [vmem:[#allocation5 + $0xf00] sm:$0xff] }
  0x7b   :  { %v278_v6 = vadd.f32 %v277_v42, %v276_v4  ;;  %v1133_v37 = vsel %vm1132_vm2, %v194_v5, %v1131_v13  ;;  %v2243_v20 = vpack.c.bf16 %v751_v39, %v739_v12  ;;  %v2117_v53 = vpack.c.bf16 %v748_v18, %v736_v17  ;;  %v3203_v58 = vld [vmem:[#allocation5 + $0xf60] sm:$0xff]  ;;  %v3205_v62 = vld [vmem:[#allocation5 + $0xf10] sm:$0xff]  ;;  %v3209_v28 = vld [vmem:[#allocation5 + $0xfc8] sm:$0xff] }
  0x7c   :  { %v306_v43 = vadd.f32 %v305_v56, %v304_v41  ;;  %v1135_v15 = vsel %vm1134_vm3, %v222_v9, %v1133_v37  ;;  %v2245_v23 = vpack.c.bf16 %v750_v54, %v738_v49  ;;  %v2119_v2 = vpack.c.bf16 %v773_v33, %v761_v50  ;;  %v3207_v3 = vld [vmem:[#allocation5 + $0xf70] sm:$0xff]  ;;  %v3211_v30 = vld [vmem:[#allocation5 + $0x1028] sm:$0xff]  ;;  %v3213_v4 = vld [vmem:[#allocation5 + $0xfd8] sm:$0xff] }
  0x7d   :  { %v1137_v16 = vsel %vm1136_vm4, %v250_v10, %v1135_v15  ;;  %v2247_v7 = vpack.c.bf16 %v775_v34, %v763_v59  ;;  %v3215_v40 = vld [vmem:[#allocation5 + $0x1038] sm:$0xff]  ;;  %v3217_v41 = vld [vmem:[#allocation5 + $0xfc0] sm:$0xff]  ;;  %v3221_v5 = vld [vmem:[#allocation5 + $0xfd0] sm:$0xff]  ;;  %v2121_v31 = vpack.c.bf16 %v3171_v61, %v3169_v60  ;;  %v2249_v32 = vpack.c.bf16 %v3175_v52, %v3173_v22 }
  0x7e   :  { %v1139_v48 = vsel %vm1138_vm5, %v278_v6, %v1137_v16  ;;  %v3219_v63 = vld [vmem:[#allocation5 + $0x1020] sm:$0xff]  ;;  %v3223_v9 = vld [vmem:[#allocation5 + $0x1030] sm:$0xff]  ;;  %v3225_v10 = vld [vmem:[#allocation5 + $0x1088] sm:$0xff]  ;;  %v2123_v37 = vpack.c.bf16 %v3179_v35, %v3177_v55  ;;  %v2251_v38 = vpack.c.bf16 %v3183_v1, %v3181_v0  ;;  %v2125_v18 = vpack.c.bf16 %v3187_v24, %v3185_v8 }
  0x7f   :  { %v3165_v51 = vsel %vm1140_vm6, %v306_v43, %v1139_v48  ;;  %v3227_v42 = vld [vmem:[#allocation5 + $0x10e8] sm:$0xff]  ;;  %v3233_v56 = vld [vmem:[#allocation5 + $0x1098] sm:$0xff]  ;;  %v3237_v14 = vld [vmem:[#allocation5 + $0x1080] sm:$0xff]  ;;  %v2253_v48 = vpack.c.bf16 %v3191_v26, %v3189_v25 }
  0x80   :  { %3591 = vst [vmem:[#allocation12_spill] sm:$0xff] %v3165_v51  ;;  %1232 = vmatmul.mubr.f32.vlgmr.msra.gmra.mrb[0].mxu0 %v3165_v51  ;;  %1374 = vmatmul.mubr.f32.vlgmr.msra.gmra.mrb[0].mxu1 %v3165_v51  ;;  %v3235_v13 = vld [vmem:[#allocation5 + $0x10f8] sm:$0xff]  ;;  %v3239_v46 = vld [vmem:[#allocation5 + $0x10e0] sm:$0xff]  ;;  %v3241_v57 = vld [vmem:[#allocation5 + $0x1090] sm:$0xff] }
  0x81   :  { %2114 = vmatpush1.bf16.msra.mxu0 %v2113_v47  ;;  %2242 = vmatpush1.bf16.msra.mxu1 %v2241_v45  ;;  %3592 = vst [vmem:[#allocation13_spill] sm:$0xff] %v3241_v57  ;;  %v3243_v6 = vld [vmem:[#allocation5 + $0x10f0] sm:$0xff]  ;;  %v3249_v12 = vld [vmem:[#allocation5 + $0x1148] sm:$0xff]  ;;  %v3253_v43 = vld [vmem:[#allocation5 + $0x1158] sm:$0xff] }
  0x82   :  { %2116 = vmatprep.subr.bf16.mxu0 %v2115_v19  ;;  %2244 = vmatprep.subr.bf16.mxu1 %v2243_v20  ;;  %v3251_v39 = vld [vmem:[#allocation5 + $0x11a8] sm:$0xff]  ;;  %v3255_v15 = vld [vmem:[#allocation5 + $0x11b8] sm:$0xff]  ;;  %v3257_v16 = vld [vmem:[#allocation5 + $0x1140] sm:$0xff]  ;;  %v2127_v19 = vpack.c.bf16 %v3195_v11, %v3193_v27  ;;  %v2255_v20 = vpack.c.bf16 %v3199_v29, %v3197_v21 }
  0x83   :  { %3593 = vst [vmem:[#allocation14_spill] sm:$0xff] %v3257_v16  ;;  %v3259_v47 = vld [vmem:[#allocation5 + $0x11a0] sm:$0xff]  ;;  %v3261_v45 = vld [vmem:[#allocation5 + $0x1150] sm:$0xff]  ;;  %v3273_v49 = vld [vmem:[#allocation5 + $0x1208] sm:$0xff] }
  0x84   :  { %3594 = vst [vmem:[#allocation15_spill] sm:$0xff] %v3261_v45  ;;  %v3263_v17 = vld [vmem:[#allocation5 + $0x11b0] sm:$0xff]  ;;  %v3275_v54 = vld [vmem:[#allocation5 + $0x1268] sm:$0xff]  ;;  %v3277_v50 = vld [vmem:[#allocation5 + $0x1218] sm:$0xff] }
  0x85   :  { %2118 = vmatpush1.bf16.msra.mxu0 %v2117_v53  ;;  %2246 = vmatpush1.bf16.msra.mxu1 %v2245_v23  ;;  %v3279_v33 = vld [vmem:[#allocation5 + $0x1278] sm:$0xff]  ;;  %v3281_v59 = vld [vmem:[#allocation5 + $0x1200] sm:$0xff]  ;;  %v3285_v60 = vld [vmem:[#allocation5 + $0x1210] sm:$0xff] }
  0x86   :  { %2120 = vmatprep.subr.bf16.mxu0 %v2119_v2  ;;  %2248 = vmatprep.subr.bf16.mxu1 %v2247_v7  ;;  %3595 = vst [vmem:[#allocation16_spill] sm:$0xff] %v3281_v59  ;;  %v3283_v34 = vld [vmem:[#allocation5 + $0x1260] sm:$0xff]  ;;  %3596 = vst [vmem:[#allocation17_spill] sm:$0xff] %v3285_v60  ;;  %v3287_v61 = vld [vmem:[#allocation5 + $0x1270] sm:$0xff] }
  0x87   :  { %v3297_v55 = vld [vmem:[#allocation5 + $0x12c8] sm:$0xff]  ;;  %v3301_v0 = vld [vmem:[#allocation5 + $0x12d8] sm:$0xff]  ;;  %v3305_v2 = vld [vmem:[#allocation5 + $0x12c0] sm:$0xff] }
  0x88   :  { %v3299_v35 = vld [vmem:[#allocation5 + $0x1328] sm:$0xff]  ;;  %3597 = vst [vmem:[#allocation18_spill] sm:$0xff] %v3301_v0  ;;  %v3303_v1 = vld [vmem:[#allocation5 + $0x1338] sm:$0xff]  ;;  %3599 = vst [vmem:[#allocation20_spill] sm:$0xff] %v3305_v2 }
  0x89   :  { %3598 = vst [vmem:[#allocation19_spill] sm:$0xff] %v3303_v1  ;;  %v3307_v7 = vld [vmem:[#allocation5 + $0x1320] sm:$0xff]  ;;  %2122 = vmatpush1.bf16.msra.mxu0 %v2121_v31  ;;  %2250 = vmatpush1.bf16.msra.mxu1 %v2249_v32  ;;  %v3315_v26 = vld [vmem:[#allocation5 + $0x12d0] sm:$0xff]  ;;  %v3319_v11 = vld [vmem:[#allocation5 + $0x1388] sm:$0xff] }
  0x8a   :  { %3600 = vst [vmem:[#allocation21_spill] sm:$0xff] %v3307_v7  ;;  %3601 = vst [vmem:[#allocation22_spill] sm:$0xff] %v3315_v26  ;;  %v3317_v27 = vld [vmem:[#allocation5 + $0x1330] sm:$0xff]  ;;  %v3321_v21 = vld [vmem:[#allocation5 + $0x13e8] sm:$0xff]  ;;  %2124 = vmatprep.subr.bf16.mxu0 %v2123_v37  ;;  %2252 = vmatprep.subr.bf16.mxu1 %v2251_v38 }
  0x8b   :  { %3602 = vst [vmem:[#allocation23_spill] sm:$0xff] %v3317_v27  ;;  %3603 = vst [vmem:[#allocation24_spill] sm:$0xff] %v3319_v11  ;;  %v3323_v29 = vld [vmem:[#allocation5 + $0x1398] sm:$0xff]  ;;  %v3333_v8 = vld [vmem:[#allocation5 + $0x1380] sm:$0xff] }
  0x8c   :  { %3604 = vst [vmem:[#allocation25_spill] sm:$0xff] %v3321_v21  ;;  %3605 = vst [vmem:[#allocation26_spill] sm:$0xff] %v3323_v29  ;;  %v3325_v31 = vld [vmem:[#allocation5 + $0x13f8] sm:$0xff]  ;;  %v3335_v23 = vld [vmem:[#allocation5 + $0x13e0] sm:$0xff] }
  0x8d   :  { %3606 = vst [vmem:[#allocation27_spill] sm:$0xff] %v3325_v31  ;;  %3607 = vst [vmem:[#allocation28_spill] sm:$0xff] %v3333_v8  ;;  %v3337_v53 = vld [vmem:[#allocation5 + $0x1390] sm:$0xff]  ;;  %v3341_v22 = vld [vmem:[#allocation5 + $0x1448] sm:$0xff]  ;;  %2126 = vmatpush1.bf16.msra.mxu0 %v2125_v18  ;;  %2254 = vmatpush1.bf16.msra.mxu1 %v2253_v48  ;;  %v3613_v18 = vpack.c.bf16 %v3207_v3, %v3205_v62 }
  0x8e   :  { %v3339_v52 = vld [vmem:[#allocation5 + $0x13f0] sm:$0xff]  ;;  %v3351_v32 = vld [vmem:[#allocation5 + $0x14a8] sm:$0xff]  ;;  %v3353_v51 = vld [vmem:[#allocation5 + $0x1458] sm:$0xff]  ;;  %2128 = vmatprep.subr.bf16.mxu0 %v2127_v19  ;;  %2256 = vmatprep.subr.bf16.mxu1 %v2255_v20  ;;  %v3612_v20 = vpack.c.bf16 %v3203_v58, %v3201_v36  ;;  %v3615_v36 = vpack.c.bf16 %v3215_v40, %v3213_v4  ;;  %v3616_v4 = vpack.c.bf16 %v3219_v63, %v3217_v41 }
  0x8f   :  { %v3365_v16 = vld [vmem:[#allocation5 + $0x1440] sm:$0xff]  ;;  %v3369_v45 = vld [vmem:[#allocation5 + $0x1450] sm:$0xff]  ;;  %v3379_v25 = vld [vmem:[#allocation5 + $0x1508] sm:$0xff]  ;;  %v3617_v40 = vpack.c.bf16 %v3223_v9, %v3221_v5 }
  0x90   :  { %3608 = vst [vmem:[#allocation29_spill] sm:$0xff] %v3365_v16  ;;  %v3367_v24 = vld [vmem:[#allocation5 + $0x14a0] sm:$0xff]  ;;  %v3377_v59 = vld [vmem:[#allocation5 + $0x14b0] sm:$0xff]  ;;  %3610 = vst [vmem:[#allocation31_spill] sm:$0xff] %v3379_v25 }
  0x91   :  { %3609 = vst [vmem:[#allocation30_spill] sm:$0xff] %v3367_v24  ;;  %v3381_v60 = vld [vmem:[#allocation5 + $0x1568] sm:$0xff]  ;;  %v3389_v57 = vld [vmem:[#allocation5 + $0x1518] sm:$0xff]  ;;  %2130 = vmatpush1.bf16.msra.mxu0 %v3612_v20  ;;  %2258 = vmatpush1.bf16.msra.mxu1 %v3613_v18 }
  0x92   :  { %3611 = vst [vmem:[#allocation32_spill] sm:$0xff] %v3381_v60  ;;  %v3391_v38 = vld [vmem:[#allocation5 + $0x1578] sm:$0xff]  ;;  %2260 = vmatprep.subr.bf16.mxu1 %v3615_v36 }
  0x93   :  { %v43_v2 = vld [vmem:[#allocation2 + $0x18] sm:$0xff] }
  0x94   :  { %v47_v7 = vld [vmem:[#allocation2 + $0x38] sm:$0xff] }
  0x95   :  { %v51_v0 = vld [vmem:[#allocation2 + $0x58] sm:$0xff]  ;;  %v125_v37 = vadd.f32 %v47_v7, %v43_v2  ;;  %v2287_v7 = vpack.c.bf16 %v3391_v38, %v3389_v57  ;;  %2262 = vmatpush1.bf16.msra.mxu1 %v3617_v40  ;;  %v1048_v57 = vld [vmem:[#allocation5 + $0x1680] sm:$0xff] }
  0x96   :  { %v55_v48 = vld [vmem:[#allocation2 + $0x78] sm:$0xff]  ;;  %v1060_v38 = vld [vmem:[#allocation5 + $0x16e0] sm:$0xff] }
  0x97   :  { %v59_v11 = vld [vmem:[#allocation2 + $0x98] sm:$0xff]  ;;  %v153_v19 = vadd.f32 %v55_v48, %v51_v0  ;;  %v126_v24 = vrot.slane %v125_v37, 4 }
  0x98   :  { %v63_v21 = vld [vmem:[#allocation2 + $0xb8] sm:$0xff] }
  0x99   :  { %v67_v26 = vld [vmem:[#allocation2 + $0xd8] sm:$0xff]  ;;  %v181_v8 = vadd.f32 %v63_v21, %v59_v11  ;;  %v3614_v11 = vpack.c.bf16 %v3211_v30, %v3209_v28  ;;  %v154_v21 = vrot.slane %v153_v19, 4 }
  0x9a   :  { %v71_v27 = vld [vmem:[#allocation2 + $0xf8] sm:$0xff] }
  0x9b   :  { %v75_v1 = vld [vmem:[#allocation2 + $0x118] sm:$0xff]  ;;  %v209_v0 = vadd.f32 %v71_v27, %v67_v26  ;;  %2132 = vmatprep.subr.bf16.mxu0 %v3614_v11  ;;  %v182_v18 = vrot.slane %v181_v8, 4  ;;  %v127_v26 = vadd.f32 %v126_v24, %v125_v37  ;;  %v155_v28 = vadd.f32 %v154_v21, %v153_v19 }
  0x9c   :  { %v79_v31 = vld [vmem:[#allocation2 + $0x138] sm:$0xff]  ;;  %2134 = vmatpush1.bf16.msra.mxu0 %v3616_v4  ;;  %v3618_v24 = vpack.c.bf16 %v3227_v42, %v3225_v10  ;;  %v3620_v10 = vpack.c.bf16 %v3239_v46, %v3237_v14  ;;  %v3621_v42 = vld [vmem:[#allocation13_spill] sm:$0xff] }
  0x9d   :  { %v83_v29 = vld [vmem:[#allocation2 + $0x158] sm:$0xff]  ;;  %v237_v48 = vadd.f32 %v79_v31, %v75_v1  ;;  %v210_v27 = vrot.slane %v209_v0, 4  ;;  %v183_v30 = vadd.f32 %v182_v18, %v181_v8  ;;  %v3619_v8 = vpack.c.bf16 %v3235_v13, %v3233_v56 }
  0x9e   :  { %v87_v16 = vld [vmem:[#allocation2 + $0x178] sm:$0xff]  ;;  %2136 = vmatprep.subr.bf16.mxu0 %v3618_v24  ;;  %v156_v37 = vrot.slane %v155_v28, 2  ;;  %v3622_v56 = vpack.c.bf16 %v3243_v6, %v3621_v42  ;;  %v3627_v24 = vld [vmem:[#allocation15_spill] sm:$0xff]  ;;  %v74_v42 = vld [vmem:[#allocation2 + $0x110] sm:$0xff] }
  0x9f   :  { %v91_v58 = vld [vmem:[#allocation2 + $0x198] sm:$0xff]  ;;  %v265_v20 = vadd.f32 %v87_v16, %v83_v29  ;;  %v238_v11 = vrot.slane %v237_v48, 4  ;;  %v128_v16 = vrot.slane %v127_v26, 2  ;;  %v211_v1 = vadd.f32 %v210_v27, %v209_v0  ;;  %2264 = vmatprep.subr.bf16.mxu1 %v3619_v8  ;;  %v42_v27 = vld [vmem:[#allocation2 + $0x10] sm:$0xff] }
  0xa0   :  { %v95_v62 = vld [vmem:[#allocation2 + $0x1b8] sm:$0xff]  ;;  %v184_v19 = vrot.slane %v183_v30, 2  ;;  %2138 = vmatpush1.bf16.msra.mxu0 %v3620_v10  ;;  %2266 = vmatpush1.bf16.msra.mxu1 %v3622_v56  ;;  %v3628_v8 = vpack.c.bf16 %v3263_v17, %v3627_v24 }
  0xa1   :  { %v99_v3 = vld [vmem:[#allocation2 + $0x1d8] sm:$0xff]  ;;  %v293_v25 = vadd.f32 %v95_v62, %v91_v58  ;;  %v266_v60 = vrot.slane %v265_v20, 4  ;;  %v239_v41 = vadd.f32 %v238_v11, %v237_v48  ;;  %v129_v36 = vadd.f32 %v128_v16, %v127_v26 }
  0xa2   :  { %v103_v2 = vld [vmem:[#allocation2 + $0x1f8] sm:$0xff]  ;;  %v212_v58 = vrot.slane %v211_v1, 2  ;;  %v157_v62 = vadd.f32 %v156_v37, %v155_v28  ;;  %v185_v0 = vadd.f32 %v184_v19, %v183_v30  ;;  %v3624_v48 = vpack.c.bf16 %v3255_v15, %v3253_v43  ;;  %v46_v28 = vld [vmem:[#allocation2 + $0x30] sm:$0xff] }
  0xa3   :  { %v294_v29 = vrot.slane %v293_v25, 4  ;;  %v321_v31 = vadd.f32 %v103_v2, %v99_v3  ;;  %v267_v63 = vadd.f32 %v266_v60, %v265_v20  ;;  %v240_v21 = vrot.slane %v239_v41, 2  ;;  %v3625_v43 = vld [vmem:[#allocation14_spill] sm:$0xff] }
  0xa4   :  { %v130_v13 = vrot.slane %v129_v36, 1  ;;  %v213_v3 = vadd.f32 %v212_v58, %v211_v1  ;;  %2268 = vmatprep.subr.bf16.mxu1 %v3624_v48  ;;  %v158_v20 = vrot.slane %v157_v62, 1  ;;  %v186_v26 = vrot.slane %v185_v0, 1  ;;  %v70_v58 = vld [vmem:[#allocation2 + $0xf0] sm:$0xff] }
  0xa5   :  { %v295_v5 = vadd.f32 %v294_v29, %v293_v25  ;;  %v322_v9 = vrot.slane %v321_v31, 4  ;;  %v268_v2 = vrot.slane %v267_v63, 2  ;;  %v3623_v25 = vpack.c.bf16 %v3251_v39, %v3249_v12  ;;  %v50_v12 = vld [vmem:[#allocation2 + $0x50] sm:$0xff]  ;;  %2270 = vmatpush1.bf16.msra.mxu1 %v3628_v8 }
  0xa6   :  { %v241_v14 = vadd.f32 %v240_v21, %v239_v41  ;;  %v131_v6 = vadd.f32 %v130_v13, %v129_v36  ;;  %v214_v30 = vrot.slane %v213_v3, 1  ;;  %v159_v40 = vadd.f32 %v158_v20, %v157_v62  ;;  %v54_v39 = vld [vmem:[#allocation2 + $0x70] sm:$0xff] }
  0xa7   :  { %v296_v18 = vrot.slane %v295_v5, 2  ;;  %v323_v60 = vadd.f32 %v322_v9, %v321_v31  ;;  %2140 = vmatprep.subr.bf16.mxu0 %v3623_v25  ;;  %v269_v46 = vadd.f32 %v268_v2, %v267_v63  ;;  %v187_v16 = vadd.f32 %v186_v26, %v185_v0  ;;  %v58_v31 = vld [vmem:[#allocation2 + $0x90] sm:$0xff] }
  0xa8   :  { %v242_v1 = vrot.slane %v241_v14, 1  ;;  %v3626_v15 = vpack.c.bf16 %v3259_v47, %v3625_v43  ;;  %v215_v37 = vadd.f32 %v214_v30, %v213_v3  ;;  %v62_v63 = vld [vmem:[#allocation2 + $0xb0] sm:$0xff]  ;;  %v3629_v9 = vpack.c.bf16 %v3275_v54, %v3273_v49 }
  0xa9   :  { %v297_v11 = vadd.f32 %v296_v18, %v295_v5  ;;  %v324_v4 = vrot.slane %v323_v60, 2  ;;  %v270_v29 = vrot.slane %v269_v46, 1  ;;  %v66_v36 = vld [vmem:[#allocation2 + $0xd0] sm:$0xff]  ;;  %v118_v5 = vadd.f32 %v46_v28, %v42_v27  ;;  %v3636_v28 = vld [vmem:[#allocation19_spill] sm:$0xff] }
  0xaa   :  { %2142 = vmatpush1.bf16.msra.mxu0 %v3626_v15  ;;  %v3630_v62 = vpack.c.bf16 %v3279_v33, %v3277_v50  ;;  %v243_v47 = vadd.f32 %v242_v1, %v241_v14  ;;  %v1156_v17 = vsel %vm1128_vm0, %v159_v40, %v131_v6  ;;  %v78_v3 = vld [vmem:[#allocation2 + $0x130] sm:$0xff]  ;;  %v146_v54 = vadd.f32 %v54_v39, %v50_v12  ;;  %v3631_v50 = vld [vmem:[#allocation16_spill] sm:$0xff]  ;;  %v3637_v6 = vld [vmem:[#allocation18_spill] sm:$0xff] }
  0xab   :  { %v298_v19 = vrot.slane %v297_v11, 1  ;;  %v325_v41 = vadd.f32 %v324_v4, %v323_v60  ;;  %2144 = vmatprep.subr.bf16.mxu0 %v3629_v9  ;;  %v271_v0 = vadd.f32 %v270_v29, %v269_v46  ;;  %v1157_v10 = vsel %vm1130_vm1, %v187_v16, %v1156_v17  ;;  %v82_v18 = vld [vmem:[#allocation2 + $0x150] sm:$0xff] }
  0xac   :  { %2272 = vmatprep.subr.bf16.mxu1 %v3630_v62  ;;  %v119_v56 = vrot.slane %v118_v5, 4  ;;  %v1158_v13 = vsel %vm1132_vm2, %v215_v37, %v1157_v10  ;;  %v86_v49 = vld [vmem:[#allocation2 + $0x170] sm:$0xff]  ;;  %v174_v60 = vadd.f32 %v62_v63, %v58_v31  ;;  %v202_v25 = vadd.f32 %v70_v58, %v66_v36  ;;  %v3640_v37 = vld [vmem:[#allocation20_spill] sm:$0xff]  ;;  %v3643_v63 = vld [vmem:[#allocation22_spill] sm:$0xff] }
  0xad   :  { %v299_v21 = vadd.f32 %v298_v19, %v297_v11  ;;  %v326_v2 = vrot.slane %v325_v41, 1  ;;  %v3632_v33 = vpack.c.bf16 %v3283_v34, %v3631_v50  ;;  %v3633_v48 = vld [vmem:[#allocation17_spill] sm:$0xff]  ;;  %v1159_v14 = vsel %vm1134_vm3, %v243_v47, %v1158_v13 }
  0xae   :  { %v3634_v20 = vpack.c.bf16 %v3287_v61, %v3633_v48  ;;  %v120_v46 = vadd.f32 %v119_v56, %v118_v5  ;;  %v3635_v27 = vpack.c.bf16 %v3299_v35, %v3297_v55  ;;  %v3638_v30 = vpack.c.bf16 %v3636_v28, %v3637_v6  ;;  %v90_v34 = vld [vmem:[#allocation2 + $0x190] sm:$0xff] }
  0xaf   :  { %2146 = vmatpush1.bf16.msra.mxu0 %v3632_v33  ;;  %v327_v26 = vadd.f32 %v326_v2, %v325_v41  ;;  %v1160_v11 = vsel %vm1136_vm4, %v271_v0, %v1159_v14  ;;  %v94_v4 = vld [vmem:[#allocation2 + $0x1b0] sm:$0xff]  ;;  %v147_v40 = vrot.slane %v146_v54, 4  ;;  %v175_v16 = vrot.slane %v174_v60, 4  ;;  %v3642_v41 = vld [vmem:[#allocation23_spill] sm:$0xff]  ;;  %v3646_v0 = vld [vmem:[#allocation24_spill] sm:$0xff] }
  0xb0   :  { %2274 = vmatpush1.bf16.msra.mxu1 %v3634_v20  ;;  %2148 = vmatprep.subr.bf16.mxu0 %v3635_v27  ;;  %v203_v61 = vrot.slane %v202_v25, 4  ;;  %v1161_v1 = vsel %vm1138_vm5, %v299_v21, %v1160_v11  ;;  %v98_v29 = vld [vmem:[#allocation2 + $0x1d0] sm:$0xff]  ;;  %v121_v39 = vrot.slane %v120_v46, 2  ;;  %v230_v31 = vadd.f32 %v78_v3, %v74_v42  ;;  %v3648_v21 = vld [vmem:[#allocation27_spill] sm:$0xff]  ;;  %v3649_v2 = vld [vmem:[#allocation26_spill] sm:$0xff] }
  0xb1   :  { %2276 = vmatprep.subr.bf16.mxu1 %v3638_v30  ;;  %v102_v12 = vld [vmem:[#allocation2 + $0x1f0] sm:$0xff]  ;;  %v258_v43 = vadd.f32 %v86_v49, %v82_v18  ;;  %v3476_v55 = vsel %vm1140_vm6, %v327_v26, %v1161_v1  ;;  %v148_v35 = vadd.f32 %v147_v40, %v146_v54  ;;  %v176_v15 = vadd.f32 %v175_v16, %v174_v60  ;;  %v3651_v26 = vld [vmem:[#allocation28_spill] sm:$0xff]  ;;  %v1012_v27 = vld [vmem:[#allocation5 + $0x1560] sm:$0xff] }
  0xb2   :  { %v204_v24 = vadd.f32 %v203_v61, %v202_v25  ;;  %v3639_v8 = vld [vmem:[#allocation21_spill] sm:$0xff]  ;;  %v3644_v36 = vpack.c.bf16 %v3642_v41, %v3643_v63  ;;  %v122_v58 = vadd.f32 %v121_v39, %v120_v46  ;;  %v231_v5 = vrot.slane %v230_v31, 4  ;;  %1302 = vmatprep.mubr.f32.mxu0 %v3476_v55  ;;  %1444 = vmatprep.mubr.f32.mxu1 %v3476_v55  ;;  %v1000_v25 = vld [vmem:[#allocation5 + $0x1500] sm:$0xff]  ;;  %v1037_v61 = vld [vmem:[#allocation5 + $0x1628] sm:$0xff] }
  0xb3   :  { %v3641_v19 = vpack.c.bf16 %v3639_v8, %v3640_v37  ;;  %v259_v9 = vrot.slane %v258_v43, 4  ;;  %v286_v62 = vadd.f32 %v94_v4, %v90_v34  ;;  %v3645_v47 = vld [vmem:[#allocation25_spill] sm:$0xff]  ;;  %v3650_v10 = vpack.c.bf16 %v3648_v21, %v3649_v2  ;;  %v1039_v39 = vld [vmem:[#allocation5 + $0x1638] sm:$0xff]  ;;  %v1024_v41 = vld [vmem:[#allocation5 + $0x15c0] sm:$0xff] }
  0xb4   :  { %2278 = vmatpush1.bf16.msra.mxu1 %v3644_v36  ;;  %v3647_v17 = vpack.c.bf16 %v3645_v47, %v3646_v0  ;;  %v149_v42 = vrot.slane %v148_v35, 2  ;;  %v177_v56 = vrot.slane %v176_v15, 2  ;;  %v205_v13 = vrot.slane %v204_v24, 2  ;;  %v1002_v28 = vld [vmem:[#allocation5 + $0x1510] sm:$0xff]  ;;  %v1036_v63 = vld [vmem:[#allocation5 + $0x1620] sm:$0xff]  ;;  %v1049_v2 = vld [vmem:[#allocation5 + $0x1688] sm:$0xff] }
  0xb5   :  { %2150 = vmatpush1.bf16.msra.mxu0 %v3641_v19  ;;  %2280 = vmatprep.subr.bf16.mxu1 %v3650_v10  ;;  %v314_v3 = vadd.f32 %v102_v12, %v98_v29  ;;  %v123_v18 = vrot.slane %v122_v58, 1  ;;  %v232_v49 = vadd.f32 %v231_v5, %v230_v31  ;;  %v260_v54 = vadd.f32 %v259_v9, %v258_v43  ;;  %v1014_v6 = vld [vmem:[#allocation5 + $0x1570] sm:$0xff]  ;;  %v1027_v12 = vld [vmem:[#allocation5 + $0x15d8] sm:$0xff]  ;;  %v3660_v9 = vld [vmem:[#allocation32_spill] sm:$0xff] }
  0xb6   :  { %2152 = vmatprep.subr.bf16.mxu0 %v3647_v17  ;;  %v287_v60 = vrot.slane %v286_v62, 4  ;;  %v150_v50 = vadd.f32 %v149_v42, %v148_v35  ;;  %v178_v33 = vadd.f32 %v177_v56, %v176_v15  ;;  %v206_v48 = vadd.f32 %v205_v13, %v204_v24  ;;  %v3657_v37 = vld [vmem:[#allocation29_spill] sm:$0xff]  ;;  %v1061_v10 = vld [vmem:[#allocation5 + $0x16e8] sm:$0xff]  ;;  %v1051_v42 = vld [vmem:[#allocation5 + $0x1698] sm:$0xff] }
  0xb7   :  { %v315_v20 = vrot.slane %v314_v3, 4  ;;  %v3652_v14 = vpack.c.bf16 %v3335_v23, %v3651_v26  ;;  %v3653_v46 = vpack.c.bf16 %v3339_v52, %v3337_v53  ;;  %v124_v30 = vadd.f32 %v123_v18, %v122_v58  ;;  %v1025_v23 = vld [vmem:[#allocation5 + $0x15c8] sm:$0xff]  ;;  %v1026_v17 = vld [vmem:[#allocation5 + $0x15d0] sm:$0xff]  ;;  %v1063_v56 = vld [vmem:[#allocation5 + $0x16f8] sm:$0xff] }
  0xb8   :  { %v233_v11 = vrot.slane %v232_v49, 2  ;;  %v261_v34 = vrot.slane %v260_v54, 2  ;;  %v288_v4 = vadd.f32 %v287_v60, %v286_v62  ;;  %v3654_v40 = vpack.c.bf16 %v3351_v32, %v3341_v22  ;;  %v3656_v32 = vld [vmem:[#allocation30_spill] sm:$0xff]  ;;  %v3661_v62 = vld [vmem:[#allocation31_spill] sm:$0xff]  ;;  %v1038_v21 = vld [vmem:[#allocation5 + $0x1630] sm:$0xff] }
  0xb9   :  { %2154 = vmatpush1.bf16.msra.mxu0 %v3652_v14  ;;  %2282 = vmatpush1.bf16.msra.mxu1 %v3653_v46  ;;  %v3655_v16 = vpack.c.bf16 %v3355_v44, %v3353_v51  ;;  %v151_v1 = vrot.slane %v150_v50, 1  ;;  %v179_v52 = vrot.slane %v178_v33, 1  ;;  %v207_v53 = vrot.slane %v206_v48, 1  ;;  %v1085_v14 = vld [vmem:[#allocation5 + $0x17a8] sm:$0xff]  ;;  %v1075_v46 = vld [vmem:[#allocation5 + $0x1758] sm:$0xff] }
  0xba   :  { %2156 = vmatprep.subr.bf16.mxu0 %v3654_v40  ;;  %v316_v29 = vadd.f32 %v315_v20, %v314_v3  ;;  %v234_v31 = vadd.f32 %v233_v11, %v232_v49  ;;  %v262_v43 = vadd.f32 %v261_v34, %v260_v54  ;;  %v289_v35 = vrot.slane %v288_v4, 2  ;;  %v1073_v20 = vld [vmem:[#allocation5 + $0x1748] sm:$0xff]  ;;  %v1072_v34 = vld [vmem:[#allocation5 + $0x1740] sm:$0xff] }
  0xbb   :  { %2284 = vmatprep.subr.bf16.mxu1 %v3655_v16  ;;  %v2161_v15 = vpack.c.bf16 %v1012_v27, %v1000_v25  ;;  %v2289_v24 = vpack.c.bf16 %v1014_v6, %v1002_v28  ;;  %v152_v8 = vadd.f32 %v151_v1, %v150_v50  ;;  %v180_v22 = vadd.f32 %v179_v52, %v178_v33  ;;  %v1050_v33 = vld [vmem:[#allocation5 + $0x1690] sm:$0xff]  ;;  %v1087_v27 = vld [vmem:[#allocation5 + $0x17b8] sm:$0xff] }
  0xbc   :  { %v3658_v19 = vpack.c.bf16 %v3656_v32, %v3657_v37  ;;  %v3659_v44 = vpack.c.bf16 %v3377_v59, %v3369_v45  ;;  %v2163_v51 = vpack.c.bf16 %v1037_v61, %v1025_v23  ;;  %v208_v36 = vadd.f32 %v207_v53, %v206_v48  ;;  %v1062_v48 = vld [vmem:[#allocation5 + $0x16f0] sm:$0xff]  ;;  %v333_v53 = vld [vmem:[#allocation5 + $0x28] sm:$0xff] }
  0xbd   :  { %v235_v58 = vrot.slane %v234_v31, 1  ;;  %v317_v5 = vrot.slane %v316_v29, 2  ;;  %v3662_v47 = vpack.c.bf16 %v3660_v9, %v3661_v62  ;;  %v2291_v0 = vpack.c.bf16 %v1039_v39, %v1027_v12  ;;  %v1074_v61 = vld [vmem:[#allocation5 + $0x1750] sm:$0xff]  ;;  %v345_v12 = vld [vmem:[#allocation5 + $0x88] sm:$0xff]  ;;  %v335_v39 = vld [vmem:[#allocation5 + $0x38] sm:$0xff] }
  0xbe   :  { %2158 = vmatpush1.bf16.msra.mxu0 %v3658_v19  ;;  %2286 = vmatpush1.bf16.msra.mxu1 %v3659_v44  ;;  %v290_v45 = vadd.f32 %v289_v35, %v288_v4  ;;  %v1149_v59 = vsel %vm1128_vm0, %v152_v8, %v124_v30  ;;  %v263_v13 = vrot.slane %v262_v43, 1  ;;  %v2165_v18 = vpack.c.bf16 %v1036_v63, %v1024_v41  ;;  %v1084_v4 = vld [vmem:[#allocation5 + $0x17a0] sm:$0xff]  ;;  %v1086_v1 = vld [vmem:[#allocation5 + $0x17b0] sm:$0xff]  ;;  %v369_v41 = vld [vmem:[#allocation5 + $0x148] sm:$0xff] }
  0xbf   :  { %2160 = vmatprep.subr.bf16.mxu0 %v3662_v47  ;;  %2288 = vmatprep.subr.bf16.mxu1 %v2287_v7  ;;  %v1150_v3 = vsel %vm1130_vm1, %v180_v22, %v1149_v59  ;;  %v236_v49 = vadd.f32 %v235_v58, %v234_v31  ;;  %v2293_v54 = vpack.c.bf16 %v1038_v21, %v1026_v17  ;;  %v347_v31 = vld [vmem:[#allocation5 + $0x98] sm:$0xff]  ;;  %v344_v8 = vld [vmem:[#allocation5 + $0x80] sm:$0xff]  ;;  %v334_v19 = vld [vmem:[#allocation5 + $0x30] sm:$0xff] }
  0xc0   :  { %v318_v7 = vadd.f32 %v317_v5, %v316_v29  ;;  %v1151_v60 = vsel %vm1132_vm2, %v208_v36, %v1150_v3  ;;  %v2167_v25 = vpack.c.bf16 %v1061_v10, %v1049_v2  ;;  %v2295_v50 = vpack.c.bf16 %v1063_v56, %v1051_v42  ;;  %v346_v44 = vld [vmem:[#allocation5 + $0x90] sm:$0xff]  ;;  %v359_v63 = vld [vmem:[#allocation5 + $0xf8] sm:$0xff]  ;;  %v356_v62 = vld [vmem:[#allocation5 + $0xe0] sm:$0xff] }
  0xc1   :  { %v291_v26 = vrot.slane %v290_v45, 1  ;;  %v264_v28 = vadd.f32 %v263_v13, %v262_v43  ;;  %v1152_v6 = vsel %vm1134_vm3, %v236_v49, %v1151_v60  ;;  %v2169_v30 = vpack.c.bf16 %v1060_v38, %v1048_v57  ;;  %v371_v36 = vld [vmem:[#allocation5 + $0x158] sm:$0xff]  ;;  %v368_v47 = vld [vmem:[#allocation5 + $0x140] sm:$0xff]  ;;  %v358_v21 = vld [vmem:[#allocation5 + $0xf0] sm:$0xff] }
  0xc2   :  { %2162 = vmatpush1.bf16.msra.mxu0 %v2161_v15  ;;  %2290 = vmatpush1.bf16.msra.mxu1 %v2289_v24  ;;  %v2297_v11 = vpack.c.bf16 %v1062_v48, %v1050_v33  ;;  %v319_v40 = vrot.slane %v318_v7, 1  ;;  %v2171_v16 = vpack.c.bf16 %v1085_v14, %v1073_v20  ;;  %v2299_v23 = vpack.c.bf16 %v1087_v27, %v1075_v46  ;;  %v332_v24 = vld [vmem:[#allocation5 + $0x20] sm:$0xff]  ;;  %v370_v2 = vld [vmem:[#allocation5 + $0x150] sm:$0xff]  ;;  %v393_v59 = vld [vmem:[#allocation5 + $0x208] sm:$0xff] }
  0xc3   :  { %2164 = vmatprep.subr.bf16.mxu0 %v2163_v51  ;;  %2292 = vmatprep.subr.bf16.mxu1 %v2291_v0  ;;  %v292_v52 = vadd.f32 %v291_v26, %v290_v45  ;;  %v1153_v29 = vsel %vm1136_vm4, %v264_v28, %v1152_v6  ;;  %v2173_v43 = vpack.c.bf16 %v1084_v4, %v1072_v34  ;;  %v357_v51 = vld [vmem:[#allocation5 + $0xe8] sm:$0xff]  ;;  %v383_v10 = vld [vmem:[#allocation5 + $0x1b8] sm:$0xff]  ;;  %v380_v3 = vld [vmem:[#allocation5 + $0x1a0] sm:$0xff] }
  0xc4   :  { %v2301_v35 = vpack.c.bf16 %v1086_v1, %v1074_v61  ;;  %v320_v15 = vadd.f32 %v319_v40, %v318_v7  ;;  %v2303_v32 = vpack.c.bf16 %v345_v12, %v333_v53  ;;  %v2431_v37 = vpack.c.bf16 %v347_v31, %v335_v39  ;;  %v381_v45 = vld [vmem:[#allocation5 + $0x1a8] sm:$0xff]  ;;  %v395_v42 = vld [vmem:[#allocation5 + $0x218] sm:$0xff]  ;;  %v382_v57 = vld [vmem:[#allocation5 + $0x1b0] sm:$0xff] }
  0xc5   :  { %v1154_v22 = vsel %vm1138_vm5, %v292_v52, %v1153_v29  ;;  %v2305_v5 = vpack.c.bf16 %v344_v8, %v332_v24  ;;  %v2433_v9 = vpack.c.bf16 %v346_v44, %v334_v19  ;;  %v2307_v0 = vpack.c.bf16 %v369_v41, %v357_v51  ;;  %v394_v38 = vld [vmem:[#allocation5 + $0x210] sm:$0xff]  ;;  %v405_v7 = vld [vmem:[#allocation5 + $0x268] sm:$0xff]  ;;  %v3663_v33 = vld [vmem:[#allocation11_spill] sm:$0xff] }
  0xc6   :  { %2166 = vmatpush1.bf16.msra.mxu0 %v2165_v18  ;;  %2294 = vmatpush1.bf16.msra.mxu1 %v2293_v54  ;;  %v3523_v58 = vsel %vm1140_vm6, %v320_v15, %v1154_v22  ;;  %v2435_v17 = vpack.c.bf16 %v371_v36, %v359_v63  ;;  %v2309_v56 = vpack.c.bf16 %v368_v47, %v356_v62  ;;  %v392_v18 = vld [vmem:[#allocation5 + $0x200] sm:$0xff]  ;;  %v417_v60 = vld [vmem:[#allocation5 + $0x2c8] sm:$0xff]  ;;  %v406_v28 = vld [vmem:[#allocation5 + $0x270] sm:$0xff] }
  0xc7   :  { %2168 = vmatprep.subr.bf16.mxu0 %v2167_v25  ;;  %2296 = vmatprep.subr.bf16.mxu1 %v2295_v50  ;;  %v2437_v13 = vpack.c.bf16 %v370_v2, %v358_v21  ;;  %v2311_v49 = vpack.c.bf16 %v393_v59, %v381_v45  ;;  %v2439_v54 = vpack.c.bf16 %v395_v42, %v383_v10  ;;  %v407_v25 = vld [vmem:[#allocation5 + $0x278] sm:$0xff]  ;;  %v404_v26 = vld [vmem:[#allocation5 + $0x260] sm:$0xff]  ;;  %v418_v6 = vld [vmem:[#allocation5 + $0x2d0] sm:$0xff] }
  0xc8   :  { %v419_v50 = vld [vmem:[#allocation5 + $0x2d8] sm:$0xff]  ;;  %v2313_v48 = vpack.c.bf16 %v392_v18, %v380_v3  ;;  %v2441_v20 = vpack.c.bf16 %v394_v38, %v382_v57  ;;  %v416_v14 = vld [vmem:[#allocation5 + $0x2c0] sm:$0xff]  ;;  %v2315_v46 = vpack.c.bf16 %v417_v60, %v405_v7  ;;  %v430_v53 = vld [vmem:[#allocation5 + $0x330] sm:$0xff] }
  0xc9   :  { %v2443_v27 = vpack.c.bf16 %v419_v50, %v407_v25  ;;  %v431_v34 = vld [vmem:[#allocation5 + $0x338] sm:$0xff]  ;;  %v2317_v40 = vpack.c.bf16 %v416_v14, %v404_v26  ;;  %v440_v61 = vld [vmem:[#allocation5 + $0x380] sm:$0xff]  ;;  %v442_v29 = vld [vmem:[#allocation5 + $0x390] sm:$0xff] }
  0xca   :  { %2170 = vmatpush1.bf16.msra.mxu0 %v2169_v30  ;;  %2298 = vmatpush1.bf16.msra.mxu1 %v2297_v11  ;;  %v429_v30 = vld [vmem:[#allocation5 + $0x328] sm:$0xff]  ;;  %v443_v4 = vld [vmem:[#allocation5 + $0x398] sm:$0xff]  ;;  %v2449_v15 = vpack.c.bf16 %v442_v29, %v430_v53  ;;  %v452_v24 = vld [vmem:[#allocation5 + $0x3e0] sm:$0xff] }
  0xcb   :  { %2172 = vmatprep.subr.bf16.mxu0 %v2171_v16  ;;  %2300 = vmatprep.subr.bf16.mxu1 %v2299_v23  ;;  %v441_v11 = vld [vmem:[#allocation5 + $0x388] sm:$0xff]  ;;  %v2445_v16 = vpack.c.bf16 %v418_v6, %v406_v28  ;;  %v428_v23 = vld [vmem:[#allocation5 + $0x320] sm:$0xff]  ;;  %v2447_v52 = vpack.c.bf16 %v443_v4, %v431_v34  ;;  %v455_v31 = vld [vmem:[#allocation5 + $0x3f8] sm:$0xff] }
  0xcc   :  { %v2319_v1 = vpack.c.bf16 %v441_v11, %v429_v30  ;;  %v453_v12 = vld [vmem:[#allocation5 + $0x3e8] sm:$0xff]  ;;  %v464_v8 = vld [vmem:[#allocation5 + $0x440] sm:$0xff]  ;;  %v466_v19 = vld [vmem:[#allocation5 + $0x450] sm:$0xff] }
  0xcd   :  { %v465_v39 = vld [vmem:[#allocation5 + $0x448] sm:$0xff]  ;;  %v479_v41 = vld [vmem:[#allocation5 + $0x4b8] sm:$0xff]  ;;  %v2325_v36 = vpack.c.bf16 %v464_v8, %v452_v24  ;;  %v488_v62 = vld [vmem:[#allocation5 + $0x500] sm:$0xff] }
  0xce   :  { %2174 = vmatpush1.bf16.msra.mxu0 %v2173_v43  ;;  %2302 = vmatpush1.bf16.msra.mxu1 %v2301_v35  ;;  %v467_v43 = vld [vmem:[#allocation5 + $0x458] sm:$0xff]  ;;  %v2321_v35 = vpack.c.bf16 %v440_v61, %v428_v23  ;;  %v2323_v22 = vpack.c.bf16 %v465_v39, %v453_v12  ;;  %v477_v44 = vld [vmem:[#allocation5 + $0x4a8] sm:$0xff]  ;;  %v490_v21 = vld [vmem:[#allocation5 + $0x510] sm:$0xff] }
  0xcf   :  { %2304 = vmatprep.subr.bf16.mxu0 %v2303_v32  ;;  %2432 = vmatprep.subr.bf16.mxu1 %v2431_v37  ;;  %v2451_v32 = vpack.c.bf16 %v467_v43, %v455_v31  ;;  %v454_v37 = vld [vmem:[#allocation5 + $0x3f0] sm:$0xff]  ;;  %v489_v51 = vld [vmem:[#allocation5 + $0x508] sm:$0xff]  ;;  %v491_v63 = vld [vmem:[#allocation5 + $0x518] sm:$0xff] }
  0xd0   :  { %v2327_v47 = vpack.c.bf16 %v489_v51, %v477_v44  ;;  %v501_v2 = vld [vmem:[#allocation5 + $0x568] sm:$0xff]  ;;  %v503_v59 = vld [vmem:[#allocation5 + $0x578] sm:$0xff]  ;;  %v512_v3 = vld [vmem:[#allocation5 + $0x5c0] sm:$0xff] }
  0xd1   :  { %1303 = vmatmul.mubr.f32.vlgmr.msra.gmra.mrb[0].mxu0 %v3523_v58  ;;  %1445 = vmatmul.mubr.f32.vlgmr.msra.gmra.mrb[0].mxu1 %v3523_v58  ;;  %v513_v45 = vld [vmem:[#allocation5 + $0x5c8] sm:$0xff]  ;;  %v515_v10 = vld [vmem:[#allocation5 + $0x5d8] sm:$0xff]  ;;  %v514_v57 = vld [vmem:[#allocation5 + $0x5d0] sm:$0xff] }
  0xd2   :  { %2306 = vmatpush1.bf16.msra.mxu0 %v2305_v5  ;;  %2434 = vmatpush1.bf16.msra.mxu1 %v2433_v9  ;;  %v2453_v5 = vpack.c.bf16 %v466_v19, %v454_v37  ;;  %v476_v9 = vld [vmem:[#allocation5 + $0x4a0] sm:$0xff]  ;;  %v2331_v18 = vpack.c.bf16 %v513_v45, %v501_v2  ;;  %v525_v38 = vld [vmem:[#allocation5 + $0x628] sm:$0xff]  ;;  %v527_v60 = vld [vmem:[#allocation5 + $0x638] sm:$0xff] }
  0xd3   :  { %2308 = vmatprep.subr.bf16.mxu0 %v2307_v0  ;;  %2436 = vmatprep.subr.bf16.mxu1 %v2435_v17  ;;  %v2455_v0 = vpack.c.bf16 %v491_v63, %v479_v41  ;;  %v478_v17 = vld [vmem:[#allocation5 + $0x4b0] sm:$0xff]  ;;  %v2329_v42 = vpack.c.bf16 %v488_v62, %v476_v9  ;;  %v537_v7 = vld [vmem:[#allocation5 + $0x688] sm:$0xff]  ;;  %v539_v25 = vld [vmem:[#allocation5 + $0x698] sm:$0xff] }
  0xd4   :  { %1515 = vmatprep.mubr.f32.mxu0 %v3663_v33  ;;  %1657 = vmatprep.mubr.f32.mxu1 %v3663_v33  ;;  %v536_v26 = vld [vmem:[#allocation5 + $0x680] sm:$0xff]  ;;  %v2335_v14 = vpack.c.bf16 %v537_v7, %v525_v38  ;;  %v538_v28 = vld [vmem:[#allocation5 + $0x690] sm:$0xff]  ;;  %v549_v6 = vld [vmem:[#allocation5 + $0x6e8] sm:$0xff] }
  0xd5   :  { %v561_v30 = vld [vmem:[#allocation5 + $0x748] sm:$0xff]  ;;  %v551_v11 = vld [vmem:[#allocation5 + $0x6f8] sm:$0xff]  ;;  %v560_v23 = vld [vmem:[#allocation5 + $0x740] sm:$0xff] }
  0xd6   :  { %2310 = vmatpush1.bf16.msra.mxu0 %v2309_v56  ;;  %2438 = vmatpush1.bf16.msra.mxu1 %v2437_v13  ;;  %v2457_v56 = vpack.c.bf16 %v490_v21, %v478_v17  ;;  %v500_v13 = vld [vmem:[#allocation5 + $0x560] sm:$0xff]  ;;  %v563_v34 = vld [vmem:[#allocation5 + $0x758] sm:$0xff]  ;;  %v2339_v61 = vpack.c.bf16 %v561_v30, %v549_v6  ;;  %v562_v53 = vld [vmem:[#allocation5 + $0x750] sm:$0xff] }
  0xd7   :  { %2312 = vmatprep.subr.bf16.mxu0 %v2311_v49  ;;  %2440 = vmatprep.subr.bf16.mxu1 %v2439_v54  ;;  %v2459_v49 = vpack.c.bf16 %v515_v10, %v503_v59  ;;  %v502_v54 = vld [vmem:[#allocation5 + $0x570] sm:$0xff]  ;;  %v2333_v50 = vpack.c.bf16 %v512_v3, %v500_v13  ;;  %v573_v29 = vld [vmem:[#allocation5 + $0x7a8] sm:$0xff]  ;;  %v575_v39 = vld [vmem:[#allocation5 + $0x7b8] sm:$0xff] }
  0xd8   :  { %v585_v12 = vld [vmem:[#allocation5 + $0x808] sm:$0xff]  ;;  %v587_v31 = vld [vmem:[#allocation5 + $0x818] sm:$0xff]  ;;  %v584_v24 = vld [vmem:[#allocation5 + $0x800] sm:$0xff] }
  0xd9   :  { %v2343_v8 = vpack.c.bf16 %v585_v12, %v573_v29  ;;  %v586_v37 = vld [vmem:[#allocation5 + $0x810] sm:$0xff]  ;;  %v597_v19 = vld [vmem:[#allocation5 + $0x868] sm:$0xff]  ;;  %v599_v51 = vld [vmem:[#allocation5 + $0x878] sm:$0xff] }
  0xda   :  { %2314 = vmatpush1.bf16.msra.mxu0 %v2313_v48  ;;  %2442 = vmatpush1.bf16.msra.mxu1 %v2441_v20  ;;  %v2461_v48 = vpack.c.bf16 %v514_v57, %v502_v54  ;;  %v524_v20 = vld [vmem:[#allocation5 + $0x620] sm:$0xff]  ;;  %v609_v44 = vld [vmem:[#allocation5 + $0x8c8] sm:$0xff]  ;;  %v611_v41 = vld [vmem:[#allocation5 + $0x8d8] sm:$0xff] }
  0xdb   :  { %2316 = vmatprep.subr.bf16.mxu0 %v2315_v46  ;;  %2444 = vmatprep.subr.bf16.mxu1 %v2443_v27  ;;  %v2463_v46 = vpack.c.bf16 %v539_v25, %v527_v60  ;;  %v526_v27 = vld [vmem:[#allocation5 + $0x630] sm:$0xff]  ;;  %v2337_v4 = vpack.c.bf16 %v536_v26, %v524_v20  ;;  %v608_v9 = vld [vmem:[#allocation5 + $0x8c0] sm:$0xff]  ;;  %v2347_v62 = vpack.c.bf16 %v609_v44, %v597_v19  ;;  %v621_v21 = vld [vmem:[#allocation5 + $0x928] sm:$0xff] }
  0xdc   :  { %v610_v17 = vld [vmem:[#allocation5 + $0x8d0] sm:$0xff]  ;;  %v633_v2 = vld [vmem:[#allocation5 + $0x988] sm:$0xff]  ;;  %v623_v45 = vld [vmem:[#allocation5 + $0x938] sm:$0xff] }
  0xdd   :  { %v635_v59 = vld [vmem:[#allocation5 + $0x998] sm:$0xff]  ;;  %v632_v13 = vld [vmem:[#allocation5 + $0x980] sm:$0xff]  ;;  %v2351_v3 = vpack.c.bf16 %v633_v2, %v621_v21  ;;  %v634_v54 = vld [vmem:[#allocation5 + $0x990] sm:$0xff] }
  0xde   :  { %2318 = vmatpush1.bf16.msra.mxu0 %v2317_v40  ;;  %2446 = vmatpush1.bf16.msra.mxu1 %v2445_v16  ;;  %v2465_v40 = vpack.c.bf16 %v538_v28, %v526_v27  ;;  %v548_v16 = vld [vmem:[#allocation5 + $0x6e0] sm:$0xff]  ;;  %v645_v57 = vld [vmem:[#allocation5 + $0x9e8] sm:$0xff]  ;;  %v647_v7 = vld [vmem:[#allocation5 + $0x9f8] sm:$0xff] }
  0xdf   :  { %2320 = vmatprep.subr.bf16.mxu0 %v2319_v1  ;;  %2448 = vmatprep.subr.bf16.mxu1 %v2447_v52  ;;  %v2467_v1 = vpack.c.bf16 %v563_v34, %v551_v11  ;;  %v550_v52 = vld [vmem:[#allocation5 + $0x6f0] sm:$0xff]  ;;  %v2341_v43 = vpack.c.bf16 %v560_v23, %v548_v16  ;;  %v657_v38 = vld [vmem:[#allocation5 + $0xa48] sm:$0xff]  ;;  %v659_v60 = vld [vmem:[#allocation5 + $0xa58] sm:$0xff] }
  0xe0   :  { %v656_v20 = vld [vmem:[#allocation5 + $0xa40] sm:$0xff]  ;;  %v2355_v26 = vpack.c.bf16 %v657_v38, %v645_v57  ;;  %v658_v27 = vld [vmem:[#allocation5 + $0xa50] sm:$0xff]  ;;  %v669_v28 = vld [vmem:[#allocation5 + $0xaa8] sm:$0xff] }
  0xe1   :  { %v681_v6 = vld [vmem:[#allocation5 + $0xb08] sm:$0xff]  ;;  %v671_v30 = vld [vmem:[#allocation5 + $0xab8] sm:$0xff]  ;;  %v680_v16 = vld [vmem:[#allocation5 + $0xb00] sm:$0xff] }
  0xe2   :  { %2322 = vmatpush1.bf16.msra.mxu0 %v2321_v35  ;;  %2450 = vmatpush1.bf16.msra.mxu1 %v2449_v15  ;;  %v2469_v35 = vpack.c.bf16 %v562_v53, %v550_v52  ;;  %v572_v15 = vld [vmem:[#allocation5 + $0x7a0] sm:$0xff]  ;;  %v683_v11 = vld [vmem:[#allocation5 + $0xb18] sm:$0xff]  ;;  %v2359_v23 = vpack.c.bf16 %v681_v6, %v669_v28  ;;  %v682_v52 = vld [vmem:[#allocation5 + $0xb10] sm:$0xff] }
  0xe3   :  { %2324 = vmatprep.subr.bf16.mxu0 %v2323_v22  ;;  %2452 = vmatprep.subr.bf16.mxu1 %v2451_v32  ;;  %v2471_v22 = vpack.c.bf16 %v587_v31, %v575_v39  ;;  %v574_v32 = vld [vmem:[#allocation5 + $0x7b0] sm:$0xff]  ;;  %v2345_v63 = vpack.c.bf16 %v584_v24, %v572_v15  ;;  %v693_v53 = vld [vmem:[#allocation5 + $0xb68] sm:$0xff]  ;;  %v695_v12 = vld [vmem:[#allocation5 + $0xb78] sm:$0xff] }
  0xe4   :  { %v705_v29 = vld [vmem:[#allocation5 + $0xbc8] sm:$0xff]  ;;  %v707_v39 = vld [vmem:[#allocation5 + $0xbd8] sm:$0xff]  ;;  %v704_v15 = vld [vmem:[#allocation5 + $0xbc0] sm:$0xff] }
  0xe5   :  { %v2363_v24 = vpack.c.bf16 %v705_v29, %v693_v53  ;;  %v729_v19 = vld [vmem:[#allocation5 + $0xc88] sm:$0xff]  ;;  %v719_v44 = vld [vmem:[#allocation5 + $0xc38] sm:$0xff] }
  0xe6   :  { %2326 = vmatpush1.bf16.msra.mxu0 %v2325_v36  ;;  %2454 = vmatpush1.bf16.msra.mxu1 %v2453_v5  ;;  %v2473_v36 = vpack.c.bf16 %v586_v37, %v574_v32  ;;  %v596_v5 = vld [vmem:[#allocation5 + $0x860] sm:$0xff]  ;;  %v706_v32 = vld [vmem:[#allocation5 + $0xbd0] sm:$0xff]  ;;  %v717_v37 = vld [vmem:[#allocation5 + $0xc28] sm:$0xff] }
  0xe7   :  { %2328 = vmatprep.subr.bf16.mxu0 %v2327_v47  ;;  %2456 = vmatprep.subr.bf16.mxu1 %v2455_v0  ;;  %v2475_v47 = vpack.c.bf16 %v611_v41, %v599_v51  ;;  %v598_v0 = vld [vmem:[#allocation5 + $0x870] sm:$0xff]  ;;  %v2349_v10 = vpack.c.bf16 %v608_v9, %v596_v5  ;;  %v731_v51 = vld [vmem:[#allocation5 + $0xc98] sm:$0xff]  ;;  %v728_v5 = vld [vmem:[#allocation5 + $0xc80] sm:$0xff]  ;;  %v2367_v9 = vpack.c.bf16 %v729_v19, %v717_v37 }
  0xe8   :  { %v753_v21 = vld [vmem:[#allocation5 + $0xd48] sm:$0xff]  ;;  %v743_v2 = vld [vmem:[#allocation5 + $0xcf8] sm:$0xff] }
  0xe9   :  { %v777_v57 = vld [vmem:[#allocation5 + $0xe08] sm:$0xff]  ;;  %v767_v38 = vld [vmem:[#allocation5 + $0xdb8] sm:$0xff] }
  0xea   :  { %2330 = vmatpush1.bf16.msra.mxu0 %v2329_v42  ;;  %2458 = vmatpush1.bf16.msra.mxu1 %v2457_v56  ;;  %v2477_v42 = vpack.c.bf16 %v610_v17, %v598_v0  ;;  %v620_v56 = vld [vmem:[#allocation5 + $0x920] sm:$0xff]  ;;  %v730_v0 = vld [vmem:[#allocation5 + $0xc90] sm:$0xff]  ;;  %v741_v17 = vld [vmem:[#allocation5 + $0xce8] sm:$0xff] }
  0xeb   :  { %2332 = vmatprep.subr.bf16.mxu0 %v2331_v18  ;;  %2460 = vmatprep.subr.bf16.mxu1 %v2459_v49  ;;  %v2479_v18 = vpack.c.bf16 %v635_v59, %v623_v45  ;;  %v622_v49 = vld [vmem:[#allocation5 + $0x930] sm:$0xff]  ;;  %v2353_v25 = vpack.c.bf16 %v632_v13, %v620_v56  ;;  %v755_v45 = vld [vmem:[#allocation5 + $0xd58] sm:$0xff]  ;;  %v752_v56 = vld [vmem:[#allocation5 + $0xd40] sm:$0xff]  ;;  %v2371_v13 = vpack.c.bf16 %v753_v21, %v741_v17 }
  0xec   :  { %v789_v28 = vld [vmem:[#allocation5 + $0xe68] sm:$0xff] }
  0xed   :  { %v801_v6 = vld [vmem:[#allocation5 + $0xec8] sm:$0xff] }
  0xee   :  { %2334 = vmatpush1.bf16.msra.mxu0 %v2333_v50  ;;  %2462 = vmatpush1.bf16.msra.mxu1 %v2461_v48  ;;  %v2481_v50 = vpack.c.bf16 %v634_v54, %v622_v49  ;;  %v644_v48 = vld [vmem:[#allocation5 + $0x9e0] sm:$0xff]  ;;  %v754_v49 = vld [vmem:[#allocation5 + $0xd50] sm:$0xff]  ;;  %v765_v54 = vld [vmem:[#allocation5 + $0xda8] sm:$0xff] }
  0xef   :  { %2336 = vmatprep.subr.bf16.mxu0 %v2335_v14  ;;  %2464 = vmatprep.subr.bf16.mxu1 %v2463_v46  ;;  %v2483_v14 = vpack.c.bf16 %v659_v60, %v647_v7  ;;  %v646_v46 = vld [vmem:[#allocation5 + $0x9f0] sm:$0xff]  ;;  %v2357_v34 = vpack.c.bf16 %v656_v20, %v644_v48  ;;  %v779_v7 = vld [vmem:[#allocation5 + $0xe18] sm:$0xff]  ;;  %v3664_v60 = vld [vmem:[#allocation12_spill] sm:$0xff] }
  0xf0   :  { %v764_v48 = vld [vmem:[#allocation5 + $0xda0] sm:$0xff]  ;;  %v813_v53 = vld [vmem:[#allocation5 + $0xf28] sm:$0xff] }
  0xf1   :  { %v776_v20 = vld [vmem:[#allocation5 + $0xe00] sm:$0xff]  ;;  %v825_v29 = vld [vmem:[#allocation5 + $0xf88] sm:$0xff] }
  0xf2   :  { %2338 = vmatpush1.bf16.msra.mxu0 %v2337_v4  ;;  %2466 = vmatpush1.bf16.msra.mxu1 %v2465_v40  ;;  %v2485_v4 = vpack.c.bf16 %v658_v27, %v646_v46  ;;  %v668_v40 = vld [vmem:[#allocation5 + $0xaa0] sm:$0xff]  ;;  %v766_v46 = vld [vmem:[#allocation5 + $0xdb0] sm:$0xff]  ;;  %v837_v37 = vld [vmem:[#allocation5 + $0xfe8] sm:$0xff] }
  0xf3   :  { %2340 = vmatprep.subr.bf16.mxu0 %v2339_v61  ;;  %2468 = vmatprep.subr.bf16.mxu1 %v2467_v1  ;;  %v2487_v61 = vpack.c.bf16 %v683_v11, %v671_v30  ;;  %v670_v1 = vld [vmem:[#allocation5 + $0xab0] sm:$0xff]  ;;  %v2361_v31 = vpack.c.bf16 %v680_v16, %v668_v40  ;;  %v791_v30 = vld [vmem:[#allocation5 + $0xe78] sm:$0xff]  ;;  %v788_v40 = vld [vmem:[#allocation5 + $0xe60] sm:$0xff] }
  0xf4   :  { %v778_v27 = vld [vmem:[#allocation5 + $0xe10] sm:$0xff]  ;;  %v803_v11 = vld [vmem:[#allocation5 + $0xed8] sm:$0xff]  ;;  %v800_v16 = vld [vmem:[#allocation5 + $0xec0] sm:$0xff] }
  0xf5   :  { %v849_v19 = vld [vmem:[#allocation5 + $0x1048] sm:$0xff] }
  0xf6   :  { %2342 = vmatpush1.bf16.msra.mxu0 %v2341_v43  ;;  %2470 = vmatpush1.bf16.msra.mxu1 %v2469_v35  ;;  %v2489_v43 = vpack.c.bf16 %v682_v52, %v670_v1  ;;  %v692_v35 = vld [vmem:[#allocation5 + $0xb60] sm:$0xff]  ;;  %v790_v1 = vld [vmem:[#allocation5 + $0xe70] sm:$0xff]  ;;  %v861_v17 = vld [vmem:[#allocation5 + $0x10a8] sm:$0xff] }
  0xf7   :  { %2344 = vmatprep.subr.bf16.mxu0 %v2343_v8  ;;  %2472 = vmatprep.subr.bf16.mxu1 %v2471_v22  ;;  %v2491_v8 = vpack.c.bf16 %v707_v39, %v695_v12  ;;  %v694_v22 = vld [vmem:[#allocation5 + $0xb70] sm:$0xff]  ;;  %v2365_v41 = vpack.c.bf16 %v704_v15, %v692_v35  ;;  %v815_v12 = vld [vmem:[#allocation5 + $0xf38] sm:$0xff]  ;;  %v812_v35 = vld [vmem:[#allocation5 + $0xf20] sm:$0xff] }
  0xf8   :  { %v802_v52 = vld [vmem:[#allocation5 + $0xed0] sm:$0xff]  ;;  %v827_v39 = vld [vmem:[#allocation5 + $0xf98] sm:$0xff]  ;;  %v824_v15 = vld [vmem:[#allocation5 + $0xf80] sm:$0xff] }
  0xf9   :  { %v873_v21 = vld [vmem:[#allocation5 + $0x1108] sm:$0xff] }
  0xfa   :  { %2346 = vmatpush1.bf16.msra.mxu0 %v2345_v63  ;;  %2474 = vmatpush1.bf16.msra.mxu1 %v2473_v36  ;;  %v2493_v63 = vpack.c.bf16 %v706_v32, %v694_v22  ;;  %v716_v36 = vld [vmem:[#allocation5 + $0xc20] sm:$0xff]  ;;  %v814_v22 = vld [vmem:[#allocation5 + $0xf30] sm:$0xff] }
  0xfb   :  { %2348 = vmatprep.subr.bf16.mxu0 %v2347_v62  ;;  %2476 = vmatprep.subr.bf16.mxu1 %v2475_v47  ;;  %v2495_v62 = vpack.c.bf16 %v731_v51, %v719_v44  ;;  %v718_v47 = vld [vmem:[#allocation5 + $0xc30] sm:$0xff]  ;;  %v2369_v59 = vpack.c.bf16 %v728_v5, %v716_v36  ;;  %v839_v44 = vld [vmem:[#allocation5 + $0xff8] sm:$0xff]  ;;  %v836_v36 = vld [vmem:[#allocation5 + $0xfe0] sm:$0xff] }
  0xfc   :  { %v826_v32 = vld [vmem:[#allocation5 + $0xf90] sm:$0xff]  ;;  %v851_v51 = vld [vmem:[#allocation5 + $0x1058] sm:$0xff]  ;;  %v848_v5 = vld [vmem:[#allocation5 + $0x1040] sm:$0xff] }
  0xfe   :  { %2350 = vmatpush1.bf16.msra.mxu0 %v2349_v10  ;;  %2478 = vmatpush1.bf16.msra.mxu1 %v2477_v42  ;;  %v2497_v10 = vpack.c.bf16 %v730_v0, %v718_v47  ;;  %v740_v42 = vld [vmem:[#allocation5 + $0xce0] sm:$0xff]  ;;  %v838_v47 = vld [vmem:[#allocation5 + $0xff0] sm:$0xff] }
  0xff   :  { %2352 = vmatprep.subr.bf16.mxu0 %v2351_v3  ;;  %2480 = vmatprep.subr.bf16.mxu1 %v2479_v18  ;;  %v2499_v3 = vpack.c.bf16 %v755_v45, %v743_v2  ;;  %v742_v18 = vld [vmem:[#allocation5 + $0xcf0] sm:$0xff]  ;;  %v863_v2 = vld [vmem:[#allocation5 + $0x10b8] sm:$0xff] }
 0x100   :  { %v850_v0 = vld [vmem:[#allocation5 + $0x1050] sm:$0xff]  ;;  %v875_v45 = vld [vmem:[#allocation5 + $0x1118] sm:$0xff] }
 0x102   :  { %2354 = vmatpush1.bf16.msra.mxu0 %v2353_v25  ;;  %2482 = vmatpush1.bf16.msra.mxu1 %v2481_v50  ;;  %v2373_v25 = vpack.c.bf16 %v752_v56, %v740_v42  ;;  %v2501_v50 = vpack.c.bf16 %v754_v49, %v742_v18  ;;  %v860_v42 = vld [vmem:[#allocation5 + $0x10a0] sm:$0xff]  ;;  %v862_v18 = vld [vmem:[#allocation5 + $0x10b0] sm:$0xff] }
 0x103   :  { %2356 = vmatprep.subr.bf16.mxu0 %v2355_v26  ;;  %2484 = vmatprep.subr.bf16.mxu1 %v2483_v14  ;;  %v2375_v26 = vpack.c.bf16 %v777_v57, %v765_v54  ;;  %v2503_v14 = vpack.c.bf16 %v779_v7, %v767_v38  ;;  %v872_v56 = vld [vmem:[#allocation5 + $0x1100] sm:$0xff]  ;;  %v874_v49 = vld [vmem:[#allocation5 + $0x1110] sm:$0xff]  ;;  %v885_v54 = vld [vmem:[#allocation5 + $0x1168] sm:$0xff] }
 0x104   :  { %v897_v57 = vld [vmem:[#allocation5 + $0x11c8] sm:$0xff]  ;;  %v887_v38 = vld [vmem:[#allocation5 + $0x1178] sm:$0xff] }
 0x105   :  { %v899_v7 = vld [vmem:[#allocation5 + $0x11d8] sm:$0xff] }
 0x106   :  { %2358 = vmatpush1.bf16.msra.mxu0 %v2357_v34  ;;  %2486 = vmatpush1.bf16.msra.mxu1 %v2485_v4  ;;  %v2377_v34 = vpack.c.bf16 %v776_v20, %v764_v48  ;;  %v2505_v4 = vpack.c.bf16 %v778_v27, %v766_v46  ;;  %v884_v48 = vld [vmem:[#allocation5 + $0x1160] sm:$0xff]  ;;  %v886_v46 = vld [vmem:[#allocation5 + $0x1170] sm:$0xff] }
 0x107   :  { %2360 = vmatprep.subr.bf16.mxu0 %v2359_v23  ;;  %2488 = vmatprep.subr.bf16.mxu1 %v2487_v61  ;;  %v2379_v23 = vpack.c.bf16 %v801_v6, %v789_v28  ;;  %v2507_v61 = vpack.c.bf16 %v803_v11, %v791_v30  ;;  %v896_v20 = vld [vmem:[#allocation5 + $0x11c0] sm:$0xff]  ;;  %v898_v27 = vld [vmem:[#allocation5 + $0x11d0] sm:$0xff]  ;;  %v909_v28 = vld [vmem:[#allocation5 + $0x1228] sm:$0xff] }
 0x108   :  { %v921_v6 = vld [vmem:[#allocation5 + $0x1288] sm:$0xff]  ;;  %v911_v30 = vld [vmem:[#allocation5 + $0x1238] sm:$0xff] }
 0x109   :  { %v923_v11 = vld [vmem:[#allocation5 + $0x1298] sm:$0xff] }
 0x10a   :  { %2362 = vmatpush1.bf16.msra.mxu0 %v2361_v31  ;;  %2490 = vmatpush1.bf16.msra.mxu1 %v2489_v43  ;;  %v2381_v31 = vpack.c.bf16 %v800_v16, %v788_v40  ;;  %v2509_v43 = vpack.c.bf16 %v802_v52, %v790_v1  ;;  %v908_v40 = vld [vmem:[#allocation5 + $0x1220] sm:$0xff]  ;;  %v910_v1 = vld [vmem:[#allocation5 + $0x1230] sm:$0xff] }
 0x10b   :  { %2364 = vmatprep.subr.bf16.mxu0 %v2363_v24  ;;  %2492 = vmatprep.subr.bf16.mxu1 %v2491_v8  ;;  %v2383_v24 = vpack.c.bf16 %v825_v29, %v813_v53  ;;  %v2511_v8 = vpack.c.bf16 %v827_v39, %v815_v12  ;;  %v920_v16 = vld [vmem:[#allocation5 + $0x1280] sm:$0xff]  ;;  %v922_v52 = vld [vmem:[#allocation5 + $0x1290] sm:$0xff]  ;;  %v933_v53 = vld [vmem:[#allocation5 + $0x12e8] sm:$0xff] }
 0x10c   :  { %v945_v29 = vld [vmem:[#allocation5 + $0x1348] sm:$0xff]  ;;  %v935_v12 = vld [vmem:[#allocation5 + $0x12f8] sm:$0xff] }
 0x10d   :  { %v947_v39 = vld [vmem:[#allocation5 + $0x1358] sm:$0xff] }
 0x10e   :  { %2366 = vmatpush1.bf16.msra.mxu0 %v2365_v41  ;;  %2494 = vmatpush1.bf16.msra.mxu1 %v2493_v63  ;;  %v2385_v41 = vpack.c.bf16 %v824_v15, %v812_v35  ;;  %v2513_v63 = vpack.c.bf16 %v826_v32, %v814_v22  ;;  %v932_v35 = vld [vmem:[#allocation5 + $0x12e0] sm:$0xff]  ;;  %v934_v22 = vld [vmem:[#allocation5 + $0x12f0] sm:$0xff] }
 0x10f   :  { %2368 = vmatprep.subr.bf16.mxu0 %v2367_v9  ;;  %2496 = vmatprep.subr.bf16.mxu1 %v2495_v62  ;;  %v2387_v9 = vpack.c.bf16 %v849_v19, %v837_v37  ;;  %v2515_v62 = vpack.c.bf16 %v851_v51, %v839_v44  ;;  %v944_v15 = vld [vmem:[#allocation5 + $0x1340] sm:$0xff]  ;;  %v946_v32 = vld [vmem:[#allocation5 + $0x1350] sm:$0xff]  ;;  %v957_v37 = vld [vmem:[#allocation5 + $0x13a8] sm:$0xff] }
 0x110   :  { %v969_v19 = vld [vmem:[#allocation5 + $0x1408] sm:$0xff]  ;;  %v959_v44 = vld [vmem:[#allocation5 + $0x13b8] sm:$0xff] }
 0x111   :  { %1516 = vmatmul.mubr.f32.vlgmr.msra.gmra.mrb[2].mxu0 %v3664_v60  ;;  %1658 = vmatmul.mubr.f32.vlgmr.msra.gmra.mrb[2].mxu1 %v3664_v60  ;;  %v971_v51 = vld [vmem:[#allocation5 + $0x1418] sm:$0xff] }
 0x112   :  { %2370 = vmatpush1.bf16.msra.mxu0 %v2369_v59  ;;  %2498 = vmatpush1.bf16.msra.mxu1 %v2497_v10  ;;  %v2389_v59 = vpack.c.bf16 %v848_v5, %v836_v36  ;;  %v2517_v10 = vpack.c.bf16 %v850_v0, %v838_v47  ;;  %v956_v36 = vld [vmem:[#allocation5 + $0x13a0] sm:$0xff]  ;;  %v958_v47 = vld [vmem:[#allocation5 + $0x13b0] sm:$0xff] }
 0x113   :  { %2372 = vmatprep.subr.bf16.mxu0 %v2371_v13  ;;  %2500 = vmatprep.subr.bf16.mxu1 %v2499_v3  ;;  %v2391_v13 = vpack.c.bf16 %v873_v21, %v861_v17  ;;  %v2519_v3 = vpack.c.bf16 %v875_v45, %v863_v2  ;;  %v968_v5 = vld [vmem:[#allocation5 + $0x1400] sm:$0xff]  ;;  %v970_v0 = vld [vmem:[#allocation5 + $0x1410] sm:$0xff]  ;;  %v981_v17 = vld [vmem:[#allocation5 + $0x1468] sm:$0xff] }
 0x114   :  { %1586 = vmatprep.mubr.f32.mxu0 %v3476_v55  ;;  %1728 = vmatprep.mubr.f32.mxu1 %v3476_v55  ;;  %v993_v21 = vld [vmem:[#allocation5 + $0x14c8] sm:$0xff]  ;;  %v983_v2 = vld [vmem:[#allocation5 + $0x1478] sm:$0xff] }
 0x115   :  { %v995_v45 = vld [vmem:[#allocation5 + $0x14d8] sm:$0xff] }
 0x116   :  { %2374 = vmatpush1.bf16.msra.mxu0 %v2373_v25  ;;  %2502 = vmatpush1.bf16.msra.mxu1 %v2501_v50  ;;  %v2393_v25 = vpack.c.bf16 %v872_v56, %v860_v42  ;;  %v2521_v50 = vpack.c.bf16 %v874_v49, %v862_v18  ;;  %v980_v42 = vld [vmem:[#allocation5 + $0x1460] sm:$0xff]  ;;  %v982_v18 = vld [vmem:[#allocation5 + $0x1470] sm:$0xff] }
 0x117   :  { %2376 = vmatprep.subr.bf16.mxu0 %v2375_v26  ;;  %2504 = vmatprep.subr.bf16.mxu1 %v2503_v14  ;;  %v2395_v26 = vpack.c.bf16 %v897_v57, %v885_v54  ;;  %v2523_v14 = vpack.c.bf16 %v899_v7, %v887_v38  ;;  %v992_v56 = vld [vmem:[#allocation5 + $0x14c0] sm:$0xff]  ;;  %v994_v49 = vld [vmem:[#allocation5 + $0x14d0] sm:$0xff]  ;;  %v1005_v54 = vld [vmem:[#allocation5 + $0x1528] sm:$0xff] }
 0x118   :  { %v1017_v57 = vld [vmem:[#allocation5 + $0x1588] sm:$0xff]  ;;  %v1007_v38 = vld [vmem:[#allocation5 + $0x1538] sm:$0xff] }
 0x119   :  { %v1019_v7 = vld [vmem:[#allocation5 + $0x1598] sm:$0xff] }
 0x11a   :  { %2378 = vmatpush1.bf16.msra.mxu0 %v2377_v34  ;;  %2506 = vmatpush1.bf16.msra.mxu1 %v2505_v4  ;;  %v2397_v34 = vpack.c.bf16 %v896_v20, %v884_v48  ;;  %v2525_v4 = vpack.c.bf16 %v898_v27, %v886_v46  ;;  %v1004_v48 = vld [vmem:[#allocation5 + $0x1520] sm:$0xff]  ;;  %v1006_v46 = vld [vmem:[#allocation5 + $0x1530] sm:$0xff] }
 0x11b   :  { %2380 = vmatprep.subr.bf16.mxu0 %v2379_v23  ;;  %2508 = vmatprep.subr.bf16.mxu1 %v2507_v61  ;;  %v2399_v23 = vpack.c.bf16 %v921_v6, %v909_v28  ;;  %v2527_v61 = vpack.c.bf16 %v923_v11, %v911_v30  ;;  %v1016_v20 = vld [vmem:[#allocation5 + $0x1580] sm:$0xff]  ;;  %v1018_v27 = vld [vmem:[#allocation5 + $0x1590] sm:$0xff]  ;;  %v1029_v28 = vld [vmem:[#allocation5 + $0x15e8] sm:$0xff] }
 0x11c   :  { %v1041_v6 = vld [vmem:[#allocation5 + $0x1648] sm:$0xff]  ;;  %v1031_v30 = vld [vmem:[#allocation5 + $0x15f8] sm:$0xff] }
 0x11d   :  { %v1043_v11 = vld [vmem:[#allocation5 + $0x1658] sm:$0xff] }
 0x11e   :  { %2382 = vmatpush1.bf16.msra.mxu0 %v2381_v31  ;;  %2510 = vmatpush1.bf16.msra.mxu1 %v2509_v43  ;;  %v2401_v31 = vpack.c.bf16 %v920_v16, %v908_v40  ;;  %v2529_v43 = vpack.c.bf16 %v922_v52, %v910_v1  ;;  %v1028_v40 = vld [vmem:[#allocation5 + $0x15e0] sm:$0xff]  ;;  %v1030_v1 = vld [vmem:[#allocation5 + $0x15f0] sm:$0xff] }
 0x11f   :  { %2384 = vmatprep.subr.bf16.mxu0 %v2383_v24  ;;  %2512 = vmatprep.subr.bf16.mxu1 %v2511_v8  ;;  %v2403_v24 = vpack.c.bf16 %v945_v29, %v933_v53  ;;  %v2531_v8 = vpack.c.bf16 %v947_v39, %v935_v12  ;;  %v1040_v16 = vld [vmem:[#allocation5 + $0x1640] sm:$0xff]  ;;  %v1042_v52 = vld [vmem:[#allocation5 + $0x1650] sm:$0xff]  ;;  %v1053_v53 = vld [vmem:[#allocation5 + $0x16a8] sm:$0xff] }
 0x120   :  { %v1065_v29 = vld [vmem:[#allocation5 + $0x1708] sm:$0xff]  ;;  %v1055_v12 = vld [vmem:[#allocation5 + $0x16b8] sm:$0xff] }
 0x121   :  { %v1067_v39 = vld [vmem:[#allocation5 + $0x1718] sm:$0xff] }
 0x122   :  { %2386 = vmatpush1.bf16.msra.mxu0 %v2385_v41  ;;  %2514 = vmatpush1.bf16.msra.mxu1 %v2513_v63  ;;  %v2405_v41 = vpack.c.bf16 %v944_v15, %v932_v35  ;;  %v2533_v63 = vpack.c.bf16 %v946_v32, %v934_v22  ;;  %v1052_v35 = vld [vmem:[#allocation5 + $0x16a0] sm:$0xff]  ;;  %v1054_v22 = vld [vmem:[#allocation5 + $0x16b0] sm:$0xff] }
 0x123   :  { %2388 = vmatprep.subr.bf16.mxu0 %v2387_v9  ;;  %2516 = vmatprep.subr.bf16.mxu1 %v2515_v62  ;;  %v2407_v9 = vpack.c.bf16 %v969_v19, %v957_v37  ;;  %v2535_v62 = vpack.c.bf16 %v971_v51, %v959_v44  ;;  %v1064_v15 = vld [vmem:[#allocation5 + $0x1700] sm:$0xff]  ;;  %v1066_v32 = vld [vmem:[#allocation5 + $0x1710] sm:$0xff]  ;;  %v1077_v37 = vld [vmem:[#allocation5 + $0x1768] sm:$0xff] }
 0x124   :  { %v1089_v19 = vld [vmem:[#allocation5 + $0x17c8] sm:$0xff]  ;;  %v1079_v44 = vld [vmem:[#allocation5 + $0x1778] sm:$0xff] }
 0x125   :  { %v1091_v51 = vld [vmem:[#allocation5 + $0x17d8] sm:$0xff] }
 0x126   :  { %2390 = vmatpush1.bf16.msra.mxu0 %v2389_v59  ;;  %2518 = vmatpush1.bf16.msra.mxu1 %v2517_v10  ;;  %v2409_v59 = vpack.c.bf16 %v968_v5, %v956_v36  ;;  %v2537_v10 = vpack.c.bf16 %v970_v0, %v958_v47  ;;  %v1076_v36 = vld [vmem:[#allocation5 + $0x1760] sm:$0xff]  ;;  %v1078_v47 = vld [vmem:[#allocation5 + $0x1770] sm:$0xff] }
 0x127   :  { %2392 = vmatprep.subr.bf16.mxu0 %v2391_v13  ;;  %2520 = vmatprep.subr.bf16.mxu1 %v2519_v3  ;;  %v2411_v13 = vpack.c.bf16 %v993_v21, %v981_v17  ;;  %v2539_v3 = vpack.c.bf16 %v995_v45, %v983_v2  ;;  %v1088_v5 = vld [vmem:[#allocation5 + $0x17c0] sm:$0xff]  ;;  %v1090_v0 = vld [vmem:[#allocation5 + $0x17d0] sm:$0xff]  ;;  %v337_v17 = vld [vmem:[#allocation5 + $0x48] sm:$0xff] }
 0x128   :  { %v349_v21 = vld [vmem:[#allocation5 + $0xa8] sm:$0xff]  ;;  %v339_v2 = vld [vmem:[#allocation5 + $0x58] sm:$0xff] }
 0x129   :  { %v351_v45 = vld [vmem:[#allocation5 + $0xb8] sm:$0xff] }
 0x12a   :  { %2394 = vmatpush1.bf16.msra.mxu0 %v2393_v25  ;;  %2522 = vmatpush1.bf16.msra.mxu1 %v2521_v50  ;;  %v2413_v25 = vpack.c.bf16 %v992_v56, %v980_v42  ;;  %v2541_v50 = vpack.c.bf16 %v994_v49, %v982_v18  ;;  %v336_v42 = vld [vmem:[#allocation5 + $0x40] sm:$0xff]  ;;  %v338_v18 = vld [vmem:[#allocation5 + $0x50] sm:$0xff] }
 0x12b   :  { %2396 = vmatprep.subr.bf16.mxu0 %v2395_v26  ;;  %2524 = vmatprep.subr.bf16.mxu1 %v2523_v14  ;;  %v2415_v26 = vpack.c.bf16 %v1017_v57, %v1005_v54  ;;  %v2543_v14 = vpack.c.bf16 %v1019_v7, %v1007_v38  ;;  %v348_v56 = vld [vmem:[#allocation5 + $0xa0] sm:$0xff]  ;;  %v350_v49 = vld [vmem:[#allocation5 + $0xb0] sm:$0xff]  ;;  %v361_v54 = vld [vmem:[#allocation5 + $0x108] sm:$0xff] }
 0x12c   :  { %v373_v57 = vld [vmem:[#allocation5 + $0x168] sm:$0xff]  ;;  %v363_v38 = vld [vmem:[#allocation5 + $0x118] sm:$0xff] }
 0x12d   :  { %v375_v7 = vld [vmem:[#allocation5 + $0x178] sm:$0xff] }
 0x12e   :  { %2398 = vmatpush1.bf16.msra.mxu0 %v2397_v34  ;;  %2526 = vmatpush1.bf16.msra.mxu1 %v2525_v4  ;;  %v2417_v34 = vpack.c.bf16 %v1016_v20, %v1004_v48  ;;  %v2545_v4 = vpack.c.bf16 %v1018_v27, %v1006_v46  ;;  %v360_v48 = vld [vmem:[#allocation5 + $0x100] sm:$0xff]  ;;  %v362_v46 = vld [vmem:[#allocation5 + $0x110] sm:$0xff] }
 0x12f   :  { %2400 = vmatprep.subr.bf16.mxu0 %v2399_v23  ;;  %2528 = vmatprep.subr.bf16.mxu1 %v2527_v61  ;;  %v2419_v23 = vpack.c.bf16 %v1041_v6, %v1029_v28  ;;  %v2547_v61 = vpack.c.bf16 %v1043_v11, %v1031_v30  ;;  %v372_v20 = vld [vmem:[#allocation5 + $0x160] sm:$0xff]  ;;  %v374_v27 = vld [vmem:[#allocation5 + $0x170] sm:$0xff]  ;;  %v385_v28 = vld [vmem:[#allocation5 + $0x1c8] sm:$0xff] }
 0x130   :  { %v397_v6 = vld [vmem:[#allocation5 + $0x228] sm:$0xff]  ;;  %v387_v30 = vld [vmem:[#allocation5 + $0x1d8] sm:$0xff] }
 0x131   :  { %v399_v11 = vld [vmem:[#allocation5 + $0x238] sm:$0xff] }
 0x132   :  { %2402 = vmatpush1.bf16.msra.mxu0 %v2401_v31  ;;  %2530 = vmatpush1.bf16.msra.mxu1 %v2529_v43  ;;  %v2421_v31 = vpack.c.bf16 %v1040_v16, %v1028_v40  ;;  %v2549_v43 = vpack.c.bf16 %v1042_v52, %v1030_v1  ;;  %v384_v40 = vld [vmem:[#allocation5 + $0x1c0] sm:$0xff]  ;;  %v386_v1 = vld [vmem:[#allocation5 + $0x1d0] sm:$0xff] }
 0x133   :  { %2404 = vmatprep.subr.bf16.mxu0 %v2403_v24  ;;  %2532 = vmatprep.subr.bf16.mxu1 %v2531_v8  ;;  %v2423_v24 = vpack.c.bf16 %v1065_v29, %v1053_v53  ;;  %v2551_v8 = vpack.c.bf16 %v1067_v39, %v1055_v12  ;;  %v396_v16 = vld [vmem:[#allocation5 + $0x220] sm:$0xff]  ;;  %v398_v52 = vld [vmem:[#allocation5 + $0x230] sm:$0xff]  ;;  %v409_v53 = vld [vmem:[#allocation5 + $0x288] sm:$0xff] }
 0x134   :  { %v421_v29 = vld [vmem:[#allocation5 + $0x2e8] sm:$0xff]  ;;  %v411_v12 = vld [vmem:[#allocation5 + $0x298] sm:$0xff] }
 0x135   :  { %v423_v39 = vld [vmem:[#allocation5 + $0x2f8] sm:$0xff] }
 0x136   :  { %2406 = vmatpush1.bf16.msra.mxu0 %v2405_v41  ;;  %2534 = vmatpush1.bf16.msra.mxu1 %v2533_v63  ;;  %v2425_v41 = vpack.c.bf16 %v1064_v15, %v1052_v35  ;;  %v2553_v63 = vpack.c.bf16 %v1066_v32, %v1054_v22  ;;  %v408_v35 = vld [vmem:[#allocation5 + $0x280] sm:$0xff]  ;;  %v410_v22 = vld [vmem:[#allocation5 + $0x290] sm:$0xff] }
 0x137   :  { %2408 = vmatprep.subr.bf16.mxu0 %v2407_v9  ;;  %2536 = vmatprep.subr.bf16.mxu1 %v2535_v62  ;;  %v2427_v9 = vpack.c.bf16 %v1089_v19, %v1077_v37  ;;  %v2555_v62 = vpack.c.bf16 %v1091_v51, %v1079_v44  ;;  %v420_v15 = vld [vmem:[#allocation5 + $0x2e0] sm:$0xff]  ;;  %v422_v32 = vld [vmem:[#allocation5 + $0x2f0] sm:$0xff]  ;;  %v433_v37 = vld [vmem:[#allocation5 + $0x348] sm:$0xff] }
 0x138   :  { %v445_v19 = vld [vmem:[#allocation5 + $0x3a8] sm:$0xff]  ;;  %v435_v44 = vld [vmem:[#allocation5 + $0x358] sm:$0xff] }
 0x139   :  { %v447_v51 = vld [vmem:[#allocation5 + $0x3b8] sm:$0xff] }
 0x13a   :  { %2410 = vmatpush1.bf16.msra.mxu0 %v2409_v59  ;;  %2538 = vmatpush1.bf16.msra.mxu1 %v2537_v10  ;;  %v2429_v59 = vpack.c.bf16 %v1088_v5, %v1076_v36  ;;  %v2557_v10 = vpack.c.bf16 %v1090_v0, %v1078_v47  ;;  %v444_v36 = vld [vmem:[#allocation5 + $0x3a0] sm:$0xff]  ;;  %v2575_v5 = vpack.c.bf16 %v445_v19, %v433_v37  ;;  %v446_v47 = vld [vmem:[#allocation5 + $0x3b0] sm:$0xff]  ;;  %v457_v0 = vld [vmem:[#allocation5 + $0x408] sm:$0xff] }
 0x13b   :  { %2412 = vmatprep.subr.bf16.mxu0 %v2411_v13  ;;  %2540 = vmatprep.subr.bf16.mxu1 %v2539_v3  ;;  %v2559_v13 = vpack.c.bf16 %v349_v21, %v337_v17  ;;  %v2687_v3 = vpack.c.bf16 %v351_v45, %v339_v2  ;;  %v469_v17 = vld [vmem:[#allocation5 + $0x468] sm:$0xff]  ;;  %v459_v21 = vld [vmem:[#allocation5 + $0x418] sm:$0xff] }
 0x13c   :  { %v471_v2 = vld [vmem:[#allocation5 + $0x478] sm:$0xff]  ;;  %v565_v37 = vld [vmem:[#allocation5 + $0x768] sm:$0xff] }
 0x13d   :  { %v555_v19 = vld [vmem:[#allocation5 + $0x718] sm:$0xff] }
 0x13e   :  { %2414 = vmatpush1.bf16.msra.mxu0 %v2413_v25  ;;  %2542 = vmatpush1.bf16.msra.mxu1 %v2541_v50  ;;  %v2561_v25 = vpack.c.bf16 %v348_v56, %v336_v42  ;;  %v2689_v50 = vpack.c.bf16 %v350_v49, %v338_v18  ;;  %v468_v42 = vld [vmem:[#allocation5 + $0x460] sm:$0xff]  ;;  %v2579_v56 = vpack.c.bf16 %v469_v17, %v457_v0  ;;  %v470_v18 = vld [vmem:[#allocation5 + $0x470] sm:$0xff]  ;;  %v481_v49 = vld [vmem:[#allocation5 + $0x4c8] sm:$0xff] }
 0x13f   :  { %2416 = vmatprep.subr.bf16.mxu0 %v2415_v26  ;;  %2544 = vmatprep.subr.bf16.mxu1 %v2543_v14  ;;  %v2563_v26 = vpack.c.bf16 %v373_v57, %v361_v54  ;;  %v2691_v14 = vpack.c.bf16 %v375_v7, %v363_v38  ;;  %v493_v54 = vld [vmem:[#allocation5 + $0x528] sm:$0xff]  ;;  %v483_v57 = vld [vmem:[#allocation5 + $0x4d8] sm:$0xff] }
 0x140   :  { %v495_v38 = vld [vmem:[#allocation5 + $0x538] sm:$0xff]  ;;  %v589_v0 = vld [vmem:[#allocation5 + $0x828] sm:$0xff] }
 0x141   :  { %v579_v17 = vld [vmem:[#allocation5 + $0x7d8] sm:$0xff] }
 0x142   :  { %2418 = vmatpush1.bf16.msra.mxu0 %v2417_v34  ;;  %2546 = vmatpush1.bf16.msra.mxu1 %v2545_v4  ;;  %v2565_v34 = vpack.c.bf16 %v372_v20, %v360_v48  ;;  %v2693_v4 = vpack.c.bf16 %v374_v27, %v362_v46  ;;  %v492_v48 = vld [vmem:[#allocation5 + $0x520] sm:$0xff]  ;;  %v2583_v20 = vpack.c.bf16 %v493_v54, %v481_v49  ;;  %v494_v46 = vld [vmem:[#allocation5 + $0x530] sm:$0xff]  ;;  %v505_v27 = vld [vmem:[#allocation5 + $0x588] sm:$0xff] }
 0x143   :  { %2420 = vmatprep.subr.bf16.mxu0 %v2419_v23  ;;  %2548 = vmatprep.subr.bf16.mxu1 %v2547_v61  ;;  %v2567_v23 = vpack.c.bf16 %v397_v6, %v385_v28  ;;  %v2695_v61 = vpack.c.bf16 %v399_v11, %v387_v30  ;;  %v517_v28 = vld [vmem:[#allocation5 + $0x5e8] sm:$0xff]  ;;  %v507_v6 = vld [vmem:[#allocation5 + $0x598] sm:$0xff] }
 0x144   :  { %v519_v30 = vld [vmem:[#allocation5 + $0x5f8] sm:$0xff]  ;;  %v613_v49 = vld [vmem:[#allocation5 + $0x8e8] sm:$0xff] }
 0x145   :  { %v603_v54 = vld [vmem:[#allocation5 + $0x898] sm:$0xff] }
 0x146   :  { %2422 = vmatpush1.bf16.msra.mxu0 %v2421_v31  ;;  %2550 = vmatpush1.bf16.msra.mxu1 %v2549_v43  ;;  %v2569_v31 = vpack.c.bf16 %v396_v16, %v384_v40  ;;  %v2697_v43 = vpack.c.bf16 %v398_v52, %v386_v1  ;;  %v516_v40 = vld [vmem:[#allocation5 + $0x5e0] sm:$0xff]  ;;  %v2587_v16 = vpack.c.bf16 %v517_v28, %v505_v27  ;;  %v518_v1 = vld [vmem:[#allocation5 + $0x5f0] sm:$0xff]  ;;  %v529_v52 = vld [vmem:[#allocation5 + $0x648] sm:$0xff] }
 0x147   :  { %2424 = vmatprep.subr.bf16.mxu0 %v2423_v24  ;;  %2552 = vmatprep.subr.bf16.mxu1 %v2551_v8  ;;  %v2571_v24 = vpack.c.bf16 %v421_v29, %v409_v53  ;;  %v2699_v8 = vpack.c.bf16 %v423_v39, %v411_v12  ;;  %v541_v53 = vld [vmem:[#allocation5 + $0x6a8] sm:$0xff]  ;;  %v531_v29 = vld [vmem:[#allocation5 + $0x658] sm:$0xff] }
 0x148   :  { %v543_v12 = vld [vmem:[#allocation5 + $0x6b8] sm:$0xff]  ;;  %v637_v27 = vld [vmem:[#allocation5 + $0x9a8] sm:$0xff] }
 0x149   :  { %v627_v28 = vld [vmem:[#allocation5 + $0x958] sm:$0xff] }
 0x14a   :  { %2426 = vmatpush1.bf16.msra.mxu0 %v2425_v41  ;;  %2554 = vmatpush1.bf16.msra.mxu1 %v2553_v63  ;;  %v2573_v41 = vpack.c.bf16 %v420_v15, %v408_v35  ;;  %v432_v63 = vld [vmem:[#allocation5 + $0x340] sm:$0xff]  ;;  %v2591_v15 = vpack.c.bf16 %v541_v53, %v529_v52  ;;  %v661_v52 = vld [vmem:[#allocation5 + $0xa68] sm:$0xff]  ;;  %v651_v53 = vld [vmem:[#allocation5 + $0xa18] sm:$0xff] }
 0x14b   :  { %2428 = vmatprep.subr.bf16.mxu0 %v2427_v9  ;;  %2556 = vmatprep.subr.bf16.mxu1 %v2555_v62  ;;  %v2703_v9 = vpack.c.bf16 %v447_v51, %v435_v44  ;;  %v434_v62 = vld [vmem:[#allocation5 + $0x350] sm:$0xff]  ;;  %v2577_v45 = vpack.c.bf16 %v444_v36, %v432_v63  ;;  %v540_v35 = vld [vmem:[#allocation5 + $0x6a0] sm:$0xff]  ;;  %v567_v44 = vld [vmem:[#allocation5 + $0x778] sm:$0xff] }
 0x14c   :  { %v564_v63 = vld [vmem:[#allocation5 + $0x760] sm:$0xff] }
 0x14e   :  { %2430 = vmatpush1.bf16.msra.mxu0 %v2429_v59  ;;  %2558 = vmatpush1.bf16.msra.mxu1 %v2557_v10  ;;  %v2705_v59 = vpack.c.bf16 %v446_v47, %v434_v62  ;;  %v456_v10 = vld [vmem:[#allocation5 + $0x400] sm:$0xff]  ;;  %v566_v62 = vld [vmem:[#allocation5 + $0x770] sm:$0xff]  ;;  %v577_v47 = vld [vmem:[#allocation5 + $0x7c8] sm:$0xff] }
 0x14f   :  { %2560 = vmatprep.subr.bf16.mxu0 %v2559_v13  ;;  %2688 = vmatprep.subr.bf16.mxu1 %v2687_v3  ;;  %v2707_v13 = vpack.c.bf16 %v471_v2, %v459_v21  ;;  %v458_v3 = vld [vmem:[#allocation5 + $0x410] sm:$0xff]  ;;  %v2581_v7 = vpack.c.bf16 %v468_v42, %v456_v10  ;;  %v591_v21 = vld [vmem:[#allocation5 + $0x838] sm:$0xff]  ;;  %v588_v10 = vld [vmem:[#allocation5 + $0x820] sm:$0xff]  ;;  %v2599_v42 = vpack.c.bf16 %v589_v0, %v577_v47 }
 0x150   :  { %v709_v47 = vld [vmem:[#allocation5 + $0xbe8] sm:$0xff]  ;;  %v699_v0 = vld [vmem:[#allocation5 + $0xb98] sm:$0xff] }
 0x151   :  { %1587 = vmatmul.mubr.f32.vlgmr.msra.gmra.mrb[2].mxu0 %v3523_v58  ;;  %1729 = vmatmul.mubr.f32.vlgmr.msra.gmra.mrb[2].mxu1 %v3523_v58 }
 0x152   :  { %2562 = vmatpush1.bf16.msra.mxu0 %v2561_v25  ;;  %2690 = vmatpush1.bf16.msra.mxu1 %v2689_v50  ;;  %v2709_v25 = vpack.c.bf16 %v470_v18, %v458_v3  ;;  %v480_v50 = vld [vmem:[#allocation5 + $0x4c0] sm:$0xff]  ;;  %v590_v3 = vld [vmem:[#allocation5 + $0x830] sm:$0xff]  ;;  %v601_v18 = vld [vmem:[#allocation5 + $0x888] sm:$0xff] }
 0x153   :  { %2564 = vmatprep.subr.bf16.mxu0 %v2563_v26  ;;  %2692 = vmatprep.subr.bf16.mxu1 %v2691_v14  ;;  %v2711_v26 = vpack.c.bf16 %v495_v38, %v483_v57  ;;  %v482_v14 = vld [vmem:[#allocation5 + $0x4d0] sm:$0xff]  ;;  %v2585_v11 = vpack.c.bf16 %v492_v48, %v480_v50  ;;  %v615_v57 = vld [vmem:[#allocation5 + $0x8f8] sm:$0xff]  ;;  %v612_v50 = vld [vmem:[#allocation5 + $0x8e0] sm:$0xff]  ;;  %v2603_v48 = vpack.c.bf16 %v613_v49, %v601_v18 }
 0x154   :  { %1799 = vmatprep.mubr.f32.mxu0 %v3663_v33  ;;  %1941 = vmatprep.mubr.f32.mxu1 %v3663_v33  ;;  %v2701_v33 = vpack.c.bf16 %v422_v32, %v410_v22  ;;  %v542_v22 = vld [vmem:[#allocation5 + $0x6b0] sm:$0xff]  ;;  %v553_v32 = vld [vmem:[#allocation5 + $0x708] sm:$0xff]  ;;  %v723_v49 = vld [vmem:[#allocation5 + $0xc58] sm:$0xff] }
 0x155   :  { %v2595_v36 = vpack.c.bf16 %v565_v37, %v553_v32  ;;  %v685_v32 = vld [vmem:[#allocation5 + $0xb28] sm:$0xff]  ;;  %v675_v37 = vld [vmem:[#allocation5 + $0xad8] sm:$0xff] }
 0x156   :  { %2566 = vmatpush1.bf16.msra.mxu0 %v2565_v34  ;;  %2694 = vmatpush1.bf16.msra.mxu1 %v2693_v4  ;;  %v2713_v34 = vpack.c.bf16 %v494_v46, %v482_v14  ;;  %v504_v4 = vld [vmem:[#allocation5 + $0x580] sm:$0xff]  ;;  %v614_v14 = vld [vmem:[#allocation5 + $0x8f0] sm:$0xff]  ;;  %v625_v46 = vld [vmem:[#allocation5 + $0x948] sm:$0xff] }
 0x157   :  { %2568 = vmatprep.subr.bf16.mxu0 %v2567_v23  ;;  %2696 = vmatprep.subr.bf16.mxu1 %v2695_v61  ;;  %v2715_v23 = vpack.c.bf16 %v519_v30, %v507_v6  ;;  %v506_v61 = vld [vmem:[#allocation5 + $0x590] sm:$0xff]  ;;  %v2589_v39 = vpack.c.bf16 %v516_v40, %v504_v4  ;;  %v639_v6 = vld [vmem:[#allocation5 + $0x9b8] sm:$0xff]  ;;  %v636_v4 = vld [vmem:[#allocation5 + $0x9a0] sm:$0xff]  ;;  %v2607_v40 = vpack.c.bf16 %v637_v27, %v625_v46 }
 0x158   :  { %v733_v18 = vld [vmem:[#allocation5 + $0xca8] sm:$0xff]  ;;  %v747_v27 = vld [vmem:[#allocation5 + $0xd18] sm:$0xff] }
 0x159   :  { %v757_v46 = vld [vmem:[#allocation5 + $0xd68] sm:$0xff] }
 0x15a   :  { %2570 = vmatpush1.bf16.msra.mxu0 %v2569_v31  ;;  %2698 = vmatpush1.bf16.msra.mxu1 %v2697_v43  ;;  %v2717_v31 = vpack.c.bf16 %v518_v1, %v506_v61  ;;  %v528_v43 = vld [vmem:[#allocation5 + $0x640] sm:$0xff]  ;;  %v638_v61 = vld [vmem:[#allocation5 + $0x9b0] sm:$0xff]  ;;  %v649_v1 = vld [vmem:[#allocation5 + $0xa08] sm:$0xff] }
 0x15b   :  { %2572 = vmatprep.subr.bf16.mxu0 %v2571_v24  ;;  %2700 = vmatprep.subr.bf16.mxu1 %v2699_v8  ;;  %v2719_v24 = vpack.c.bf16 %v543_v12, %v531_v29  ;;  %v530_v8 = vld [vmem:[#allocation5 + $0x650] sm:$0xff]  ;;  %v2593_v51 = vpack.c.bf16 %v540_v35, %v528_v43  ;;  %v663_v29 = vld [vmem:[#allocation5 + $0xa78] sm:$0xff]  ;;  %v660_v43 = vld [vmem:[#allocation5 + $0xa60] sm:$0xff]  ;;  %v2611_v35 = vpack.c.bf16 %v661_v52, %v649_v1 }
 0x15c   :  { %v781_v1 = vld [vmem:[#allocation5 + $0xe28] sm:$0xff]  ;;  %v771_v52 = vld [vmem:[#allocation5 + $0xdd8] sm:$0xff] }
 0x15e   :  { %2574 = vmatpush1.bf16.msra.mxu0 %v2573_v41  ;;  %2702 = vmatpush1.bf16.msra.mxu1 %v2701_v33  ;;  %v2721_v41 = vpack.c.bf16 %v542_v22, %v530_v8  ;;  %v552_v33 = vld [vmem:[#allocation5 + $0x700] sm:$0xff]  ;;  %v662_v8 = vld [vmem:[#allocation5 + $0xa70] sm:$0xff]  ;;  %v673_v22 = vld [vmem:[#allocation5 + $0xac8] sm:$0xff] }
 0x15f   :  { %2576 = vmatprep.subr.bf16.mxu0 %v2575_v5  ;;  %2704 = vmatprep.subr.bf16.mxu1 %v2703_v9  ;;  %v2723_v5 = vpack.c.bf16 %v567_v44, %v555_v19  ;;  %v554_v9 = vld [vmem:[#allocation5 + $0x710] sm:$0xff]  ;;  %v2597_v2 = vpack.c.bf16 %v564_v63, %v552_v33  ;;  %v687_v19 = vld [vmem:[#allocation5 + $0xb38] sm:$0xff]  ;;  %v684_v33 = vld [vmem:[#allocation5 + $0xb20] sm:$0xff]  ;;  %v2615_v63 = vpack.c.bf16 %v685_v32, %v673_v22 }
 0x160   :  { %v805_v22 = vld [vmem:[#allocation5 + $0xee8] sm:$0xff]  ;;  %v795_v32 = vld [vmem:[#allocation5 + $0xe98] sm:$0xff] }
 0x162   :  { %2578 = vmatpush1.bf16.msra.mxu0 %v2577_v45  ;;  %2706 = vmatpush1.bf16.msra.mxu1 %v2705_v59  ;;  %v2725_v45 = vpack.c.bf16 %v566_v62, %v554_v9  ;;  %v576_v59 = vld [vmem:[#allocation5 + $0x7c0] sm:$0xff]  ;;  %v686_v9 = vld [vmem:[#allocation5 + $0xb30] sm:$0xff]  ;;  %v697_v62 = vld [vmem:[#allocation5 + $0xb88] sm:$0xff] }
 0x163   :  { %2580 = vmatprep.subr.bf16.mxu0 %v2579_v56  ;;  %2708 = vmatprep.subr.bf16.mxu1 %v2707_v13  ;;  %v2727_v56 = vpack.c.bf16 %v591_v21, %v579_v17  ;;  %v578_v13 = vld [vmem:[#allocation5 + $0x7d0] sm:$0xff]  ;;  %v2601_v38 = vpack.c.bf16 %v588_v10, %v576_v59  ;;  %v711_v17 = vld [vmem:[#allocation5 + $0xbf8] sm:$0xff]  ;;  %v708_v59 = vld [vmem:[#allocation5 + $0xbe0] sm:$0xff]  ;;  %v2619_v10 = vpack.c.bf16 %v709_v47, %v697_v62 }
 0x164   :  { %v819_v62 = vld [vmem:[#allocation5 + $0xf58] sm:$0xff] }
 0x165   :  { %v831_v47 = vld [vmem:[#allocation5 + $0xfb8] sm:$0xff] }
 0x166   :  { %2582 = vmatpush1.bf16.msra.mxu0 %v2581_v7  ;;  %2710 = vmatpush1.bf16.msra.mxu1 %v2709_v25  ;;  %v2729_v7 = vpack.c.bf16 %v590_v3, %v578_v13  ;;  %v600_v25 = vld [vmem:[#allocation5 + $0x880] sm:$0xff]  ;;  %v710_v13 = vld [vmem:[#allocation5 + $0xbf0] sm:$0xff]  ;;  %v721_v3 = vld [vmem:[#allocation5 + $0xc48] sm:$0xff] }
 0x167   :  { %2584 = vmatprep.subr.bf16.mxu0 %v2583_v20  ;;  %2712 = vmatprep.subr.bf16.mxu1 %v2711_v26  ;;  %v2731_v20 = vpack.c.bf16 %v615_v57, %v603_v54  ;;  %v602_v26 = vld [vmem:[#allocation5 + $0x890] sm:$0xff]  ;;  %v2605_v30 = vpack.c.bf16 %v612_v50, %v600_v25  ;;  %v735_v54 = vld [vmem:[#allocation5 + $0xcb8] sm:$0xff]  ;;  %v732_v25 = vld [vmem:[#allocation5 + $0xca0] sm:$0xff]  ;;  %v2623_v50 = vpack.c.bf16 %v733_v18, %v721_v3 }
 0x168   :  { %v855_v3 = vld [vmem:[#allocation5 + $0x1078] sm:$0xff] }
 0x16a   :  { %2586 = vmatpush1.bf16.msra.mxu0 %v2585_v11  ;;  %2714 = vmatpush1.bf16.msra.mxu1 %v2713_v34  ;;  %v2733_v11 = vpack.c.bf16 %v614_v14, %v602_v26  ;;  %v624_v34 = vld [vmem:[#allocation5 + $0x940] sm:$0xff]  ;;  %v734_v26 = vld [vmem:[#allocation5 + $0xcb0] sm:$0xff]  ;;  %v745_v14 = vld [vmem:[#allocation5 + $0xd08] sm:$0xff] }
 0x16b   :  { %2588 = vmatprep.subr.bf16.mxu0 %v2587_v16  ;;  %2716 = vmatprep.subr.bf16.mxu1 %v2715_v23  ;;  %v2735_v16 = vpack.c.bf16 %v639_v6, %v627_v28  ;;  %v626_v23 = vld [vmem:[#allocation5 + $0x950] sm:$0xff]  ;;  %v2609_v12 = vpack.c.bf16 %v636_v4, %v624_v34  ;;  %v759_v28 = vld [vmem:[#allocation5 + $0xd78] sm:$0xff]  ;;  %v756_v34 = vld [vmem:[#allocation5 + $0xd60] sm:$0xff]  ;;  %v2627_v4 = vpack.c.bf16 %v757_v46, %v745_v14 }
 0x16c   :  { %v879_v14 = vld [vmem:[#allocation5 + $0x1138] sm:$0xff] }
 0x16e   :  { %2590 = vmatpush1.bf16.msra.mxu0 %v2589_v39  ;;  %2718 = vmatpush1.bf16.msra.mxu1 %v2717_v31  ;;  %v2737_v39 = vpack.c.bf16 %v638_v61, %v626_v23  ;;  %v648_v31 = vld [vmem:[#allocation5 + $0xa00] sm:$0xff]  ;;  %v758_v23 = vld [vmem:[#allocation5 + $0xd70] sm:$0xff]  ;;  %v769_v61 = vld [vmem:[#allocation5 + $0xdc8] sm:$0xff] }
 0x16f   :  { %2592 = vmatprep.subr.bf16.mxu0 %v2591_v15  ;;  %2720 = vmatprep.subr.bf16.mxu1 %v2719_v24  ;;  %v2739_v15 = vpack.c.bf16 %v663_v29, %v651_v53  ;;  %v650_v24 = vld [vmem:[#allocation5 + $0xa10] sm:$0xff]  ;;  %v2613_v44 = vpack.c.bf16 %v660_v43, %v648_v31  ;;  %v783_v53 = vld [vmem:[#allocation5 + $0xe38] sm:$0xff]  ;;  %v780_v31 = vld [vmem:[#allocation5 + $0xe20] sm:$0xff]  ;;  %v2631_v43 = vpack.c.bf16 %v781_v1, %v769_v61 }
 0x170   :  { %v901_v61 = vld [vmem:[#allocation5 + $0x11e8] sm:$0xff]  ;;  %v891_v1 = vld [vmem:[#allocation5 + $0x1198] sm:$0xff] }
 0x172   :  { %2594 = vmatpush1.bf16.msra.mxu0 %v2593_v51  ;;  %2722 = vmatpush1.bf16.msra.mxu1 %v2721_v41  ;;  %v2741_v51 = vpack.c.bf16 %v662_v8, %v650_v24  ;;  %v672_v41 = vld [vmem:[#allocation5 + $0xac0] sm:$0xff]  ;;  %v782_v24 = vld [vmem:[#allocation5 + $0xe30] sm:$0xff]  ;;  %v793_v8 = vld [vmem:[#allocation5 + $0xe88] sm:$0xff] }
 0x173   :  { %2596 = vmatprep.subr.bf16.mxu0 %v2595_v36  ;;  %2724 = vmatprep.subr.bf16.mxu1 %v2723_v5  ;;  %v2743_v36 = vpack.c.bf16 %v687_v19, %v675_v37  ;;  %v674_v5 = vld [vmem:[#allocation5 + $0xad0] sm:$0xff]  ;;  %v2617_v21 = vpack.c.bf16 %v684_v33, %v672_v41  ;;  %v807_v37 = vld [vmem:[#allocation5 + $0xef8] sm:$0xff]  ;;  %v2635_v41 = vpack.c.bf16 %v805_v22, %v793_v8  ;;  %v913_v22 = vld [vmem:[#allocation5 + $0x1248] sm:$0xff] }
 0x174   :  { %v2763_v33 = vpack.c.bf16 %v807_v37, %v795_v32  ;;  %v902_v8 = vld [vmem:[#allocation5 + $0x11f0] sm:$0xff]  ;;  %v925_v32 = vld [vmem:[#allocation5 + $0x12a8] sm:$0xff]  ;;  %v915_v37 = vld [vmem:[#allocation5 + $0x1258] sm:$0xff] }
 0x176   :  { %2598 = vmatpush1.bf16.msra.mxu0 %v2597_v2  ;;  %2726 = vmatpush1.bf16.msra.mxu1 %v2725_v45  ;;  %v2745_v2 = vpack.c.bf16 %v686_v9, %v674_v5  ;;  %v696_v45 = vld [vmem:[#allocation5 + $0xb80] sm:$0xff]  ;;  %v817_v5 = vld [vmem:[#allocation5 + $0xf48] sm:$0xff] }
 0x177   :  { %2600 = vmatprep.subr.bf16.mxu0 %v2599_v42  ;;  %2728 = vmatprep.subr.bf16.mxu1 %v2727_v56  ;;  %v2747_v42 = vpack.c.bf16 %v711_v17, %v699_v0  ;;  %v698_v56 = vld [vmem:[#allocation5 + $0xb90] sm:$0xff]  ;;  %v2621_v57 = vpack.c.bf16 %v708_v59, %v696_v45  ;;  %v829_v9 = vld [vmem:[#allocation5 + $0xfa8] sm:$0xff]  ;;  %v816_v17 = vld [vmem:[#allocation5 + $0xf40] sm:$0xff]  ;;  %v2767_v45 = vpack.c.bf16 %v831_v47, %v819_v62 }
 0x178   :  { %v818_v59 = vld [vmem:[#allocation5 + $0xf50] sm:$0xff]  ;;  %v949_v62 = vld [vmem:[#allocation5 + $0x1368] sm:$0xff]  ;;  %v939_v47 = vld [vmem:[#allocation5 + $0x1318] sm:$0xff] }
 0x17a   :  { %2602 = vmatpush1.bf16.msra.mxu0 %v2601_v38  ;;  %2730 = vmatpush1.bf16.msra.mxu1 %v2729_v7  ;;  %v2749_v38 = vpack.c.bf16 %v710_v13, %v698_v56  ;;  %v720_v7 = vld [vmem:[#allocation5 + $0xc40] sm:$0xff]  ;;  %v853_v56 = vld [vmem:[#allocation5 + $0x1068] sm:$0xff]  ;;  %v843_v13 = vld [vmem:[#allocation5 + $0x1018] sm:$0xff] }
 0x17b   :  { %2604 = vmatprep.subr.bf16.mxu0 %v2603_v48  ;;  %2732 = vmatprep.subr.bf16.mxu1 %v2731_v20  ;;  %v2751_v48 = vpack.c.bf16 %v735_v54, %v723_v49  ;;  %v722_v20 = vld [vmem:[#allocation5 + $0xc50] sm:$0xff]  ;;  %v2625_v6 = vpack.c.bf16 %v732_v25, %v720_v7  ;;  %v840_v54 = vld [vmem:[#allocation5 + $0x1000] sm:$0xff]  ;;  %v2771_v7 = vpack.c.bf16 %v855_v3, %v843_v13  ;;  %v973_v13 = vld [vmem:[#allocation5 + $0x1428] sm:$0xff] }
 0x17c   :  { %v842_v25 = vld [vmem:[#allocation5 + $0x1010] sm:$0xff]  ;;  %v963_v3 = vld [vmem:[#allocation5 + $0x13d8] sm:$0xff] }
 0x17e   :  { %2606 = vmatpush1.bf16.msra.mxu0 %v2605_v30  ;;  %2734 = vmatpush1.bf16.msra.mxu1 %v2733_v11  ;;  %v2753_v30 = vpack.c.bf16 %v734_v26, %v722_v20  ;;  %v744_v11 = vld [vmem:[#allocation5 + $0xd00] sm:$0xff]  ;;  %v877_v20 = vld [vmem:[#allocation5 + $0x1128] sm:$0xff]  ;;  %v867_v26 = vld [vmem:[#allocation5 + $0x10d8] sm:$0xff] }
 0x17f   :  { %2608 = vmatprep.subr.bf16.mxu0 %v2607_v40  ;;  %2736 = vmatprep.subr.bf16.mxu1 %v2735_v16  ;;  %v2755_v40 = vpack.c.bf16 %v759_v28, %v747_v27  ;;  %v746_v16 = vld [vmem:[#allocation5 + $0xd10] sm:$0xff]  ;;  %v2629_v29 = vpack.c.bf16 %v756_v34, %v744_v11  ;;  %v864_v28 = vld [vmem:[#allocation5 + $0x10c0] sm:$0xff]  ;;  %v2775_v11 = vpack.c.bf16 %v879_v14, %v867_v26  ;;  %v997_v26 = vld [vmem:[#allocation5 + $0x14e8] sm:$0xff] }
 0x180   :  { %v866_v34 = vld [vmem:[#allocation5 + $0x10d0] sm:$0xff]  ;;  %v987_v14 = vld [vmem:[#allocation5 + $0x1498] sm:$0xff] }
 0x182   :  { %2610 = vmatpush1.bf16.msra.mxu0 %v2609_v12  ;;  %2738 = vmatpush1.bf16.msra.mxu1 %v2737_v39  ;;  %v2757_v12 = vpack.c.bf16 %v758_v23, %v746_v16  ;;  %v768_v39 = vld [vmem:[#allocation5 + $0xdc0] sm:$0xff] }
 0x183   :  { %2612 = vmatprep.subr.bf16.mxu0 %v2611_v35  ;;  %2740 = vmatprep.subr.bf16.mxu1 %v2739_v15  ;;  %v2759_v35 = vpack.c.bf16 %v783_v53, %v771_v52  ;;  %v770_v15 = vld [vmem:[#allocation5 + $0xdd0] sm:$0xff]  ;;  %v903_v52 = vld [vmem:[#allocation5 + $0x11f8] sm:$0xff] }
 0x184   :  { %v2761_v19 = vpack.c.bf16 %v782_v24, %v770_v15  ;;  %v2779_v15 = vpack.c.bf16 %v903_v52, %v891_v1  ;;  %v890_v24 = vld [vmem:[#allocation5 + $0x1190] sm:$0xff]  ;;  %v1023_v1 = vld [vmem:[#allocation5 + $0x15b8] sm:$0xff] }
 0x186   :  { %2614 = vmatpush1.bf16.msra.mxu0 %v2613_v44  ;;  %2742 = vmatpush1.bf16.msra.mxu1 %v2741_v51  ;;  %v792_v44 = vld [vmem:[#allocation5 + $0xe80] sm:$0xff] }
 0x187   :  { %2616 = vmatprep.subr.bf16.mxu0 %v2615_v63  ;;  %2744 = vmatprep.subr.bf16.mxu1 %v2743_v36  ;;  %v804_v51 = vld [vmem:[#allocation5 + $0xee0] sm:$0xff]  ;;  %v794_v63 = vld [vmem:[#allocation5 + $0xe90] sm:$0xff] }
 0x188   :  { %v806_v36 = vld [vmem:[#allocation5 + $0xef0] sm:$0xff]  ;;  %v2637_v0 = vpack.c.bf16 %v804_v51, %v792_v44  ;;  %v2781_v44 = vpack.c.bf16 %v902_v8, %v890_v24  ;;  %v912_v51 = vld [vmem:[#allocation5 + $0x1240] sm:$0xff]  ;;  %v1045_v24 = vld [vmem:[#allocation5 + $0x1668] sm:$0xff] }
 0x189   :  { %v1035_v8 = vld [vmem:[#allocation5 + $0x1618] sm:$0xff] }
 0x18a   :  { %2618 = vmatpush1.bf16.msra.mxu0 %v2617_v21  ;;  %2746 = vmatpush1.bf16.msra.mxu1 %v2745_v2  ;;  %v828_v21 = vld [vmem:[#allocation5 + $0xfa0] sm:$0xff]  ;;  %v2639_v2 = vpack.c.bf16 %v829_v9, %v817_v5  ;;  %v926_v5 = vld [vmem:[#allocation5 + $0x12b0] sm:$0xff]  ;;  %v937_v9 = vld [vmem:[#allocation5 + $0x1308] sm:$0xff] }
 0x18b   :  { %2620 = vmatprep.subr.bf16.mxu0 %v2619_v10  ;;  %2748 = vmatprep.subr.bf16.mxu1 %v2747_v42  ;;  %v830_v10 = vld [vmem:[#allocation5 + $0xfb0] sm:$0xff]  ;;  %v841_v42 = vld [vmem:[#allocation5 + $0x1008] sm:$0xff]  ;;  %v2641_v18 = vpack.c.bf16 %v828_v21, %v816_v17  ;;  %v936_v21 = vld [vmem:[#allocation5 + $0x1300] sm:$0xff] }
 0x18c   :  { %v2769_v49 = vpack.c.bf16 %v830_v10, %v818_v59  ;;  %v938_v10 = vld [vmem:[#allocation5 + $0x1310] sm:$0xff] }
 0x18e   :  { %2622 = vmatpush1.bf16.msra.mxu0 %v2621_v57  ;;  %2750 = vmatpush1.bf16.msra.mxu1 %v2749_v38  ;;  %v852_v57 = vld [vmem:[#allocation5 + $0x1060] sm:$0xff]  ;;  %v2643_v38 = vpack.c.bf16 %v853_v56, %v841_v42  ;;  %v950_v42 = vld [vmem:[#allocation5 + $0x1370] sm:$0xff]  ;;  %v961_v56 = vld [vmem:[#allocation5 + $0x13c8] sm:$0xff] }
 0x18f   :  { %2624 = vmatprep.subr.bf16.mxu0 %v2623_v50  ;;  %2752 = vmatprep.subr.bf16.mxu1 %v2751_v48  ;;  %v854_v50 = vld [vmem:[#allocation5 + $0x1070] sm:$0xff]  ;;  %v865_v48 = vld [vmem:[#allocation5 + $0x10c8] sm:$0xff]  ;;  %v2645_v46 = vpack.c.bf16 %v852_v57, %v840_v54  ;;  %v2789_v54 = vpack.c.bf16 %v950_v42, %v938_v10  ;;  %v960_v57 = vld [vmem:[#allocation5 + $0x13c0] sm:$0xff] }
 0x190   :  { %v2773_v27 = vpack.c.bf16 %v854_v50, %v842_v25  ;;  %v962_v50 = vld [vmem:[#allocation5 + $0x13d0] sm:$0xff]  ;;  %v1093_v10 = vld [vmem:[#allocation5 + $0x17e8] sm:$0xff]  ;;  %v1083_v42 = vld [vmem:[#allocation5 + $0x1798] sm:$0xff] }
 0x191   :  { %1800 = vmatmul.mubr.f32.vlgmr.msra.gmra.mrb[4].mxu0 %v3664_v60  ;;  %1942 = vmatmul.mubr.f32.vlgmr.msra.gmra.mrb[4].mxu1 %v3664_v60  ;;  %v2633_v60 = vpack.c.bf16 %v780_v31, %v768_v39  ;;  %v888_v31 = vld [vmem:[#allocation5 + $0x1180] sm:$0xff] }
 0x192   :  { %2626 = vmatpush1.bf16.msra.mxu0 %v2625_v6  ;;  %2754 = vmatpush1.bf16.msra.mxu1 %v2753_v30  ;;  %v876_v6 = vld [vmem:[#allocation5 + $0x1120] sm:$0xff]  ;;  %v2647_v30 = vpack.c.bf16 %v877_v20, %v865_v48  ;;  %v974_v48 = vld [vmem:[#allocation5 + $0x1430] sm:$0xff]  ;;  %v985_v20 = vld [vmem:[#allocation5 + $0x1488] sm:$0xff] }
 0x193   :  { %2628 = vmatprep.subr.bf16.mxu0 %v2627_v4  ;;  %2756 = vmatprep.subr.bf16.mxu1 %v2755_v40  ;;  %v878_v4 = vld [vmem:[#allocation5 + $0x1130] sm:$0xff]  ;;  %v889_v40 = vld [vmem:[#allocation5 + $0x1188] sm:$0xff] }
 0x194   :  { %1870 = vmatprep.mubr.f32.mxu0 %v3476_v55  ;;  %2012 = vmatprep.mubr.f32.mxu1 %v3476_v55  ;;  %v2765_v55 = vpack.c.bf16 %v806_v36, %v794_v63  ;;  %v2777_v39 = vpack.c.bf16 %v878_v4, %v866_v34  ;;  %v914_v36 = vld [vmem:[#allocation5 + $0x1250] sm:$0xff] }
 0x195   :  { %v2785_v17 = vpack.c.bf16 %v926_v5, %v914_v36  ;;  %v986_v4 = vld [vmem:[#allocation5 + $0x1490] sm:$0xff]  ;;  %v1069_v36 = vld [vmem:[#allocation5 + $0x1728] sm:$0xff]  ;;  %v1059_v5 = vld [vmem:[#allocation5 + $0x16d8] sm:$0xff] }
 0x196   :  { %2630 = vmatpush1.bf16.msra.mxu0 %v2629_v29  ;;  %2758 = vmatpush1.bf16.msra.mxu1 %v2757_v12  ;;  %v2649_v12 = vpack.c.bf16 %v876_v6, %v864_v28  ;;  %v2793_v28 = vpack.c.bf16 %v974_v48, %v962_v50  ;;  %v984_v6 = vld [vmem:[#allocation5 + $0x1480] sm:$0xff] }
 0x197   :  { %2632 = vmatprep.subr.bf16.mxu0 %v2631_v43  ;;  %2760 = vmatprep.subr.bf16.mxu1 %v2759_v35  ;;  %v900_v43 = vld [vmem:[#allocation5 + $0x11e0] sm:$0xff]  ;;  %v2651_v35 = vpack.c.bf16 %v901_v61, %v889_v40  ;;  %v998_v40 = vld [vmem:[#allocation5 + $0x14f0] sm:$0xff]  ;;  %v1011_v61 = vld [vmem:[#allocation5 + $0x1558] sm:$0xff] }
 0x19a   :  { %2634 = vmatpush1.bf16.msra.mxu0 %v2633_v60  ;;  %2762 = vmatpush1.bf16.msra.mxu1 %v2761_v19  ;;  %v927_v60 = vld [vmem:[#allocation5 + $0x12b8] sm:$0xff]  ;;  %v2653_v19 = vpack.c.bf16 %v900_v43, %v888_v31  ;;  %v2799_v31 = vpack.c.bf16 %v1023_v1, %v1011_v61  ;;  %v1010_v43 = vld [vmem:[#allocation5 + $0x1550] sm:$0xff] }
 0x19b   :  { %2636 = vmatprep.subr.bf16.mxu0 %v2635_v41  ;;  %2764 = vmatprep.subr.bf16.mxu1 %v2763_v33  ;;  %v924_v41 = vld [vmem:[#allocation5 + $0x12a0] sm:$0xff]  ;;  %v2655_v33 = vpack.c.bf16 %v925_v32, %v913_v22  ;;  %v2783_v63 = vpack.c.bf16 %v927_v60, %v915_v37  ;;  %v1047_v22 = vld [vmem:[#allocation5 + $0x1678] sm:$0xff] }
 0x19c   :  { %v1032_v60 = vld [vmem:[#allocation5 + $0x1600] sm:$0xff] }
 0x19e   :  { %2638 = vmatpush1.bf16.msra.mxu0 %v2637_v0  ;;  %2766 = vmatpush1.bf16.msra.mxu1 %v2765_v55  ;;  %v951_v0 = vld [vmem:[#allocation5 + $0x1378] sm:$0xff]  ;;  %v2657_v55 = vpack.c.bf16 %v924_v41, %v912_v51  ;;  %v2803_v51 = vpack.c.bf16 %v1047_v22, %v1035_v8  ;;  %v1034_v41 = vld [vmem:[#allocation5 + $0x1610] sm:$0xff] }
 0x19f   :  { %2640 = vmatprep.subr.bf16.mxu0 %v2639_v2  ;;  %2768 = vmatprep.subr.bf16.mxu1 %v2767_v45  ;;  %v948_v2 = vld [vmem:[#allocation5 + $0x1360] sm:$0xff]  ;;  %v2659_v45 = vpack.c.bf16 %v949_v62, %v937_v9  ;;  %v2787_v59 = vpack.c.bf16 %v951_v0, %v939_v47  ;;  %v1071_v9 = vld [vmem:[#allocation5 + $0x1738] sm:$0xff] }
 0x1a0   :  { %v1056_v0 = vld [vmem:[#allocation5 + $0x16c0] sm:$0xff] }
 0x1a2   :  { %2642 = vmatpush1.bf16.msra.mxu0 %v2641_v18  ;;  %2770 = vmatpush1.bf16.msra.mxu1 %v2769_v49  ;;  %v975_v18 = vld [vmem:[#allocation5 + $0x1438] sm:$0xff]  ;;  %v2661_v49 = vpack.c.bf16 %v948_v2, %v936_v21  ;;  %v2807_v21 = vpack.c.bf16 %v1071_v9, %v1059_v5  ;;  %v1058_v2 = vld [vmem:[#allocation5 + $0x16d0] sm:$0xff] }
 0x1a3   :  { %2644 = vmatprep.subr.bf16.mxu0 %v2643_v38  ;;  %2772 = vmatprep.subr.bf16.mxu1 %v2771_v7  ;;  %v972_v38 = vld [vmem:[#allocation5 + $0x1420] sm:$0xff]  ;;  %v2663_v7 = vpack.c.bf16 %v973_v13, %v961_v56  ;;  %v2791_v25 = vpack.c.bf16 %v975_v18, %v963_v3  ;;  %v1095_v56 = vld [vmem:[#allocation5 + $0x17f8] sm:$0xff] }
 0x1a4   :  { %v1304_v16 = vpop.f32.mrb[0].mxu0  ;;  %v1446_v23 = vpop.f32.mrb[0].mxu1  ;;  %v1080_v18 = vld [vmem:[#allocation5 + $0x1780] sm:$0xff] }
 0x1a5   :  { %2019 = vst [vmem:[#allocation7] sm:$0xff] %v1304_v16  ;;  %2021 = vst [vmem:[#allocation7 + $0x10] sm:$0xff] %v1446_v23  ;;  %v1306_v53 = vpop.f32.mrb[1].mxu0  ;;  %v1448_v29 = vpop.f32.mrb[1].mxu1  ;;  %v1009_v16 = vld [vmem:[#allocation5 + $0x1548] sm:$0xff] }
 0x1a6   :  { %2020 = vst [vmem:[#allocation7 + $0x8] sm:$0xff] %v1306_v53  ;;  %2022 = vst [vmem:[#allocation7 + $0x18] sm:$0xff] %v1448_v29  ;;  %2646 = vmatpush1.bf16.msra.mxu0 %v2645_v46  ;;  %2774 = vmatpush1.bf16.msra.mxu1 %v2773_v27  ;;  %v999_v46 = vld [vmem:[#allocation5 + $0x14f8] sm:$0xff]  ;;  %v2665_v27 = vpack.c.bf16 %v972_v38, %v960_v57  ;;  %v1021_v23 = vld [vmem:[#allocation5 + $0x15a8] sm:$0xff]  ;;  %v2797_v53 = vpack.c.bf16 %v998_v40, %v986_v4 }
 0x1a7   :  { %2648 = vmatprep.subr.bf16.mxu0 %v2647_v30  ;;  %2776 = vmatprep.subr.bf16.mxu1 %v2775_v11  ;;  %v996_v30 = vld [vmem:[#allocation5 + $0x14e0] sm:$0xff]  ;;  %v2667_v11 = vpack.c.bf16 %v997_v26, %v985_v20  ;;  %v2795_v34 = vpack.c.bf16 %v999_v46, %v987_v14  ;;  %v1082_v38 = vld [vmem:[#allocation5 + $0x1790] sm:$0xff] }
 0x1a8   :  { %v2669_v52 = vpack.c.bf16 %v996_v30, %v984_v6  ;;  %v1008_v29 = vld [vmem:[#allocation5 + $0x1540] sm:$0xff] }
 0x1a9   :  { %v1092_v57 = vld [vmem:[#allocation5 + $0x17e0] sm:$0xff] }
 0x1aa   :  { %2650 = vmatpush1.bf16.msra.mxu0 %v2649_v12  ;;  %2778 = vmatpush1.bf16.msra.mxu1 %v2777_v39  ;;  %v1020_v12 = vld [vmem:[#allocation5 + $0x15a0] sm:$0xff]  ;;  %v2671_v39 = vpack.c.bf16 %v1021_v23, %v1009_v16 }
 0x1ab   :  { %2652 = vmatprep.subr.bf16.mxu0 %v2651_v35  ;;  %2780 = vmatprep.subr.bf16.mxu1 %v2779_v15  ;;  %v1022_v35 = vld [vmem:[#allocation5 + $0x15b0] sm:$0xff]  ;;  %v1033_v15 = vld [vmem:[#allocation5 + $0x1608] sm:$0xff]  ;;  %v2673_v32 = vpack.c.bf16 %v1020_v12, %v1008_v29 }
 0x1ac   :  { %v2801_v37 = vpack.c.bf16 %v1022_v35, %v1010_v43 }
 0x1ae   :  { %2654 = vmatpush1.bf16.msra.mxu0 %v2653_v19  ;;  %2782 = vmatpush1.bf16.msra.mxu1 %v2781_v44  ;;  %v1044_v19 = vld [vmem:[#allocation5 + $0x1660] sm:$0xff]  ;;  %v2675_v44 = vpack.c.bf16 %v1045_v24, %v1033_v15 }
 0x1af   :  { %2656 = vmatprep.subr.bf16.mxu0 %v2655_v33  ;;  %2784 = vmatprep.subr.bf16.mxu1 %v2783_v63  ;;  %v1046_v33 = vld [vmem:[#allocation5 + $0x1670] sm:$0xff]  ;;  %v1057_v63 = vld [vmem:[#allocation5 + $0x16c8] sm:$0xff]  ;;  %v2677_v62 = vpack.c.bf16 %v1044_v19, %v1032_v60 }
 0x1b0   :  { %v2805_v47 = vpack.c.bf16 %v1046_v33, %v1034_v41 }
 0x1b2   :  { %2658 = vmatpush1.bf16.msra.mxu0 %v2657_v55  ;;  %2786 = vmatpush1.bf16.msra.mxu1 %v2785_v17  ;;  %v1068_v55 = vld [vmem:[#allocation5 + $0x1720] sm:$0xff]  ;;  %v2679_v17 = vpack.c.bf16 %v1069_v36, %v1057_v63 }
 0x1b3   :  { %2660 = vmatprep.subr.bf16.mxu0 %v2659_v45  ;;  %2788 = vmatprep.subr.bf16.mxu1 %v2787_v59  ;;  %v1070_v45 = vld [vmem:[#allocation5 + $0x1730] sm:$0xff]  ;;  %v1081_v59 = vld [vmem:[#allocation5 + $0x1788] sm:$0xff]  ;;  %v2681_v13 = vpack.c.bf16 %v1068_v55, %v1056_v0 }
 0x1b4   :  { %v2809_v3 = vpack.c.bf16 %v1070_v45, %v1058_v2 }
 0x1b6   :  { %2662 = vmatpush1.bf16.msra.mxu0 %v2661_v49  ;;  %2790 = vmatpush1.bf16.msra.mxu1 %v2789_v54  ;;  %v2683_v49 = vpack.c.bf16 %v1093_v10, %v1081_v59  ;;  %v2811_v54 = vpack.c.bf16 %v1095_v56, %v1083_v42 }
 0x1b7   :  { %2664 = vmatprep.subr.bf16.mxu0 %v2663_v7  ;;  %2792 = vmatprep.subr.bf16.mxu1 %v2791_v25  ;;  %v1094_v7 = vld [vmem:[#allocation5 + $0x17f0] sm:$0xff]  ;;  %v2685_v25 = vpack.c.bf16 %v1092_v57, %v1080_v18 }
 0x1b8   :  { %v2813_v50 = vpack.c.bf16 %v1094_v7, %v1082_v38 }
 0x1ba   :  { %2666 = vmatpush1.bf16.msra.mxu0 %v2665_v27  ;;  %2794 = vmatpush1.bf16.msra.mxu1 %v2793_v28 }
 0x1bb   :  { %2668 = vmatprep.subr.bf16.mxu0 %v2667_v11  ;;  %2796 = vmatprep.subr.bf16.mxu1 %v2795_v34 }
 0x1be   :  { %2670 = vmatpush1.bf16.msra.mxu0 %v2669_v52  ;;  %2798 = vmatpush1.bf16.msra.mxu1 %v2797_v53 }
 0x1bf   :  { %2672 = vmatprep.subr.bf16.mxu0 %v2671_v39  ;;  %2800 = vmatprep.subr.bf16.mxu1 %v2799_v31 }
 0x1c2   :  { %2674 = vmatpush1.bf16.msra.mxu0 %v2673_v32  ;;  %2802 = vmatpush1.bf16.msra.mxu1 %v2801_v37 }
 0x1c3   :  { %2676 = vmatprep.subr.bf16.mxu0 %v2675_v44  ;;  %2804 = vmatprep.subr.bf16.mxu1 %v2803_v51 }
 0x1c6   :  { %2678 = vmatpush1.bf16.msra.mxu0 %v2677_v62  ;;  %2806 = vmatpush1.bf16.msra.mxu1 %v2805_v47 }
 0x1c7   :  { %2680 = vmatprep.subr.bf16.mxu0 %v2679_v17  ;;  %2808 = vmatprep.subr.bf16.mxu1 %v2807_v21 }
 0x1ca   :  { %2682 = vmatpush1.bf16.msra.mxu0 %v2681_v13  ;;  %2810 = vmatpush1.bf16.msra.mxu1 %v2809_v3 }
 0x1cb   :  { %2684 = vmatprep.subr.bf16.mxu0 %v2683_v49  ;;  %2812 = vmatprep.subr.bf16.mxu1 %v2811_v54 }
 0x1ce   :  { %2686 = vmatpush1.bf16.msra.mxu0 %v2685_v25  ;;  %2814 = vmatpush1.bf16.msra.mxu1 %v2813_v50 }
 0x1d1   :  { %1871 = vmatmul.mubr.f32.vlgmr.msra.gmra.mrb[4].mxu0 %v3523_v58  ;;  %2013 = vmatmul.mubr.f32.vlgmr.msra.gmra.mrb[4].mxu1 %v3523_v58 }
 0x224   :  { %v1588_v48 = vpop.f32.mrb[2].mxu0  ;;  %v1730_v20 = vpop.f32.mrb[2].mxu1 }
 0x225   :  { %2023 = vst [vmem:[#allocation7 + $0x20] sm:$0xff] %v1588_v48  ;;  %2025 = vst [vmem:[#allocation7 + $0x30] sm:$0xff] %v1730_v20  ;;  %v1590_v26 = vpop.f32.mrb[3].mxu0  ;;  %v1732_v14 = vpop.f32.mrb[3].mxu1 }
 0x226   :  { %2024 = vst [vmem:[#allocation7 + $0x28] sm:$0xff] %v1590_v26  ;;  %2026 = vst [vmem:[#allocation7 + $0x38] sm:$0xff] %v1732_v14 }
 0x2a4   :  { %v1872_v46 = vpop.f32.mrb[4].mxu0  ;;  %v2014_v27 = vpop.f32.mrb[4].mxu1 }
 0x2a5   :  { %2027 = vst [vmem:[#allocation7 + $0x40] sm:$0xff] %v1872_v46  ;;  %2029 = vst [vmem:[#allocation7 + $0x50] sm:$0xff] %v2014_v27  ;;  %v1874_v28 = vpop.f32.mrb[5].mxu0  ;;  %v2016_v6 = vpop.f32.mrb[5].mxu1 }
 0x2a6   :  { %2028 = vst [vmem:[#allocation7 + $0x48] sm:$0xff] %v1874_v28  ;;  %2030 = vst [vmem:[#allocation7 + $0x58] sm:$0xff] %v2016_v6 }
 0x2a7   :  { %2889 = shalt.err (!%p2886_p6)
}
 0x2a8   :  { %s2890_s12 = scalar_lea.hbm %s3557_s2, 1536 }
 0x2a9   :  { %p2891_p7 = scmp.ne.s32.totalorder %s3557_s2, %s2890_s12  ;;  %p2894_p8 = scmp.lt.u32.totalorder %s2890_s12, %s3557_s2 }
 0x2ab   :  { %p2896_p9 = pnand %p2894_p8, %p2891_p7 }
 0x2ad   :  { %2899 = shalt.err (!%p2896_p9)
}
 0x2ae   :  { %2040 = dma.vmem_to_hbm [thread:$0]  %s2038_s8, 1536, %s3557_s2, [#allocation4]  }
 0x2af   :  { %2904 = dma.done.wait [#allocation4], 1536  }
 0x2b0   :  { %2905 = vsyncadd [#allocation4], 4294965760 }
 0x2b1   :  { %2044 = vsyncpa [#allocation3], 1 }
 0x2b2   :  { %2045 = vsyncpa [#allocation6], 1 }
 0x2b3   :  { %2046 = vsyncpa [#allocation4], 1 }

</bundles_post_ra>
